<compile_context>
chip_gen: v7x
topology: tpu7x:2x2x1
jax: 0.10.0
libtpu: 0.0.40
codegen_flags: <defaults>
</compile_context>

<pallas_src>
import functools
import math

import jax
import jax.numpy as jnp
import numpy as np
from jax.experimental import pallas as pl
from jax.experimental.pallas import tpu as pltpu


def _round_up(v, m):
    return (v + m - 1) // m * m


def eca_kernel_size(channels, gamma=2, b=1):
    """Channel-attention conv1d kernel size, exactly as in the PyTorch module."""
    k = int(abs((math.log(channels, 2) + b) / gamma))
    return k if k % 2 else k + 1


def _vmem_capacity_bytes():
    """Per-core VMEM capacity; conservative fallback (v7x) if query is unavailable."""
    try:
        info = pltpu.get_tpu_info()
        cap = getattr(info, "vmem_capacity_bytes", None)
        if cap:
            return int(cap)
    except Exception:
        pass
    return 64 * 1024 * 1024


def _choose_batch_block(B, per_image_bytes, vmem_cap):
    """Pick bb: amortise per-grid-step overhead without blowing the VMEM pipeline."""
    # Target >= ~512 KiB of x per grid step (per-step overhead ~0.35 us).
    target = 512 * 1024
    bb = max(1, min(B, -(-target // per_image_bytes)))
    # Keep 2x(in block) + 2x(out block) double-buffering inside a generation-gated
    # budget: ~24 MiB on v7x (64 MiB VMEM), ~48 MiB on v5e/v6e (128 MiB VMEM).
    budget = max(4 * per_image_bytes, int(0.375 * vmem_cap))
    bb = min(bb, max(1, budget // (4 * per_image_bytes)))
    # Keep at least 2 grid steps so both v7x TensorCores get work (when B allows).
    while bb > 1 and B // bb < 2:
        bb -= 1
    # bb must divide B.
    while B % bb:
        bb -= 1
    return bb


def _cbam_kernel(w_sp_ref, w_ch_ref, x_ref, o_ref, fp_ref, ch_ref, *,
                 C, H, W, bb, k_sp, k_ch, off0):
    """Fused CBAM forward for one (bb, C, H*W) block.

    w_sp_ref : SMEM (2*k_sp*k_sp,)   spatial conv weight, (chan, kh, kw) order
    w_ch_ref : SMEM (k_ch,)          channel-attention 1-D conv weight
    x_ref    : VMEM (bb, C, H*W)     input block, spatial dims flattened (lane-dense)
    o_ref    : VMEM (bb, C, H*W)     output block
    fp_ref   : VMEM (2, Ls)          zero-padded flat [avg, max] planes (scratch)
    ch_ref   : VMEM (Cp, 1)          zero-padded pooled channel vector (scratch)
    """
    HW = H * W
    pad_sp = (k_sp - 1) // 2
    pad_ch = (k_ch - 1) // 2
    Lz = HW + 2 * pad_sp             # window width needed per vertical conv tap

    # ---- loop-invariants, hoisted out of the per-image loop (computed once/step) ----
    col = jax.lax.broadcasted_iota(jnp.int32, (1, HW), 1) % W
    col_masks = []
    for kw in range(k_sp):
        d = kw - pad_sp
        col_masks.append(jnp.logical_and(col + d >= 0, col + d < W))
    w_sp = [w_sp_ref[i] for i in range(2 * k_sp * k_sp)]      # SMEM scalar reads, once
    w_ch = [w_ch_ref[j] for j in range(k_ch)]

    # Zero the padded scratch once per grid step; only the interiors are rewritten per
    # image, the zero borders provide the "same" padding.  Not guarded on
    # program_id == 0 because with a "parallel" grid each TensorCore owns its own
    # scratch and never observes step 0; the fill is only a few KiB anyway.
    fp_ref[...] = jnp.zeros_like(fp_ref)
    ch_ref[...] = jnp.zeros_like(ch_ref)

    def per_image(bi, carry):
        xb = x_ref[bi].astype(jnp.float32)                 # (C, HW), f32 compute

        # ---- pooled statistics ----
        s_avg = jnp.mean(xb, axis=1, keepdims=True)        # (C, 1)
        s_max = jnp.max(xb, axis=1, keepdims=True)         # (C, 1)
        p_avg = jnp.mean(xb, axis=0, keepdims=True)        # (1, HW)
        p_max = jnp.max(xb, axis=0, keepdims=True)         # (1, HW)

        # ---- channel attention: conv1d(avg) + conv1d(max) == conv1d(avg + max) ----
        ch_ref[pl.ds(pad_ch, C), :] = s_avg + s_max
        a = jnp.zeros((C, 1), jnp.float32)
        for j in range(k_ch):                              # shifted reads of padded vec
            a = a + ch_ref[pl.ds(j, C), :] * w_ch[j]
        v_ch = jax.nn.sigmoid(a)                           # (C, 1)
        # TODO(synk): a lane-major (1, C) layout with pltpu.roll taps would avoid the
        # misaligned sublane slices here; deferred (k_ch is tiny, cost is negligible).

        # ---- spatial attention: factored k x k conv on flat padded planes ----
        fp_ref[pl.ds(0, 1), pl.ds(off0, HW)] = p_avg       # off0 is 128-aligned (vst)
        fp_ref[pl.ds(1, 1), pl.ds(off0, HW)] = p_max
        z = [jnp.zeros((1, Lz), jnp.float32) for _ in range(k_sp)]
        for c in range(2):                                 # 0: avg plane, 1: max plane
            for kh in range(k_sp):
                start = off0 + (kh - pad_sp) * W - pad_sp
                vr = fp_ref[pl.ds(c, 1), pl.ds(start, Lz)]   # (1, Lz) row-shifted read
                base = c * k_sp * k_sp + kh * k_sp
                for kw in range(k_sp):
                    z[kw] = z[kw] + vr * w_sp[base + kw]
        y = jnp.zeros((1, HW), jnp.float32)
        for kw in range(k_sp):
            y = y + jnp.where(col_masks[kw], z[kw][:, kw:kw + HW], 0.0)
        v_sp = jax.nn.sigmoid(y)                           # (1, HW)
        # TODO(synk): for W >= 128 re-lay the planes as (H + 2*pad, W_pad) with rows on
        # sublanes (8x VALU utilisation, kw shifts on the XLU); kept flat because the
        # small-W maps targeted here would waste the 128-wide lanes either way.

        # ---- CBAM combine: out = (x * v_c) * x + v_s * x  (fresh VMEM read of x) ----
        xc = x_ref[bi].astype(jnp.float32)
        o_ref[bi] = ((xc * v_ch) * xc + v_sp * xc).astype(o_ref.dtype)
        return carry

    jax.lax.fori_loop(0, bb, per_image, 0)


def cbam_forward(x, w_sp, w_ch, *, kernel_size=7, batch_block=None, io_dtype=None):
    """CBAM forward pass.

    x        : (B, C, H, W)  input feature map (NCHW, as in PyTorch)
    w_sp     : (1, 2, k, k)  SpatialAttention conv2d weight (no bias)
    w_ch     : (1, 1, k_ch)  Channel_Attention_Module_Conv conv1d weight (no bias)
    io_dtype : optional HBM-side dtype for x / out (e.g. jnp.bfloat16); f32 compute
               is kept in-kernel.  Default: x.dtype.
    """
    assert kernel_size in (3, 7), "kernel size must be 3 or 7"
    B, C, H, W = x.shape
    k_sp = int(kernel_size)
    k_ch = int(w_ch.shape[-1])
    pad_sp = (k_sp - 1) // 2
    pad_ch = (k_ch - 1) // 2
    HW = H * W

    io_dtype = jnp.dtype(io_dtype) if io_dtype is not None else jnp.dtype(x.dtype)
    io_size = io_dtype.itemsize
    vmem_cap = _vmem_capacity_bytes()

    per_image_bytes = C * HW * io_size
    bb = int(batch_block) if batch_block is not None else _choose_batch_block(
        B, per_image_bytes, vmem_cap)
    assert B % bb == 0, "batch_block must divide the batch size"

    # Lane-dense layout: fold (H, W) into a single trailing axis (free reshape in HBM)
    # and cast to the requested I/O dtype at the boundary.
    x_flat = x.reshape(B, C, HW).astype(io_dtype)
    w_sp_flat = w_sp.reshape(2 * k_sp * k_sp).astype(jnp.float32)   # 1-D SMEM
    w_ch_flat = w_ch.reshape(k_ch).astype(jnp.float32)              # 1-D SMEM

    # Padded flat spatial plane: interior starts at a 128-aligned lane offset so the
    # per-image interior stores are plain unmasked vst; trailing zeros cover the
    # furthest row-shifted read.
    off0 = _round_up(pad_sp * (W + 1), 128)
    Ls = _round_up(off0 + HW + pad_sp * (W + 1), 128)
    Cp = C + 2 * pad_ch

    kernel = functools.partial(_cbam_kernel, C=C, H=H, W=W, bb=bb,
                               k_sp=k_sp, k_ch=k_ch, off0=off0)

    # Generation-gated VMEM request: double-buffered in + out blocks + scratch +
    # headroom, never the whole physical VMEM (v7x only has 64 MiB per core).
    block_bytes = bb * C * HW * io_size
    scratch_bytes = 4 * (2 * Ls + Cp)
    vmem_need = 4 * block_bytes + scratch_bytes + (4 << 20)
    vmem_limit = max(vmem_need, 16 << 20)
    vmem_limit = min(vmem_limit, max(int(0.75 * vmem_cap), vmem_need))

    flops = B * (8 * C * HW + 4 * k_sp * k_sp * HW + 4 * k_ch * C)
    transcendentals = B * (HW + C)
    bytes_accessed = io_size * 2 * B * C * HW + 4 * (2 * k_sp * k_sp + k_ch)

    # TODO(synk): for C*HW planes too large to hold in VMEM (e.g. C=1024 @ 64x64 on
    # v7x) add a two-phase grid (pass 1: accumulate the 4 pooled stats over x tiles,
    # pass 2: re-stream x and apply the attentions); this single-block path targets
    # small/medium feature maps.
    out_flat = pl.pallas_call(
        kernel,
        out_shape=jax.ShapeDtypeStruct((B, C, HW), io_dtype),
        grid=(B // bb,),
        in_specs=[
            pl.BlockSpec(memory_space=pltpu.SMEM),              # spatial conv weight
            pl.BlockSpec(memory_space=pltpu.SMEM),              # channel conv weight
            pl.BlockSpec((bb, C, HW), lambda b: (b, 0, 0)),     # x (flattened)
        ],
        out_specs=pl.BlockSpec((bb, C, HW), lambda b: (b, 0, 0)),
        scratch_shapes=[
            pltpu.VMEM((2, Ls), jnp.float32),                   # padded flat planes
            pltpu.VMEM((Cp, 1), jnp.float32),                   # padded pooled channels
        ],
        compiler_params=pltpu.CompilerParams(
            dimension_semantics=("parallel",),
            vmem_limit_bytes=int(vmem_limit),
        ),
        cost_estimate=pl.CostEstimate(
            flops=flops,
            transcendentals=transcendentals,
            bytes_accessed=bytes_accessed,
        ),
    )(w_sp_flat, w_ch_flat, x_flat)

    return out_flat.reshape(B, C, H, W)


def _reference(x, w_sp, w_ch, kernel_size=7):
    """Pure-JAX reference mirroring the PyTorch CBAM.forward."""
    pad_sp = (kernel_size - 1) // 2
    k_ch = w_ch.shape[-1]
    pad_ch = (k_ch - 1) // 2

    # Channel_Attention_Module_Conv
    avg_x = jnp.mean(x, axis=(2, 3))                    # (B, C)
    max_x = jnp.max(x, axis=(2, 3))                     # (B, C)

    def conv1d(v):                                      # v: (B, C)
        return jax.lax.conv_general_dilated(
            v[:, None, :], w_ch, window_strides=(1,),
            padding=[(pad_ch, pad_ch)],
            dimension_numbers=("NCH", "OIH", "NCH"),
            precision=jax.lax.Precision.HIGHEST)[:, 0, :]

    v_c = jax.nn.sigmoid(conv1d(avg_x) + conv1d(max_x))[:, :, None, None]
    x_cam = x * v_c
    out_cam = x_cam * x

    # SpatialAttention
    avg_sp = jnp.mean(x, axis=1, keepdims=True)
    max_sp = jnp.max(x, axis=1, keepdims=True)
    cat = jnp.concatenate([avg_sp, max_sp], axis=1)
    y = jax.lax.conv_general_dilated(
        cat, w_sp, window_strides=(1, 1),
        padding=[(pad_sp, pad_sp), (pad_sp, pad_sp)],
        dimension_numbers=("NCHW", "OIHW", "NCHW"),
        precision=jax.lax.Precision.HIGHEST)
    v_s = jax.nn.sigmoid(y)
    out_sam = v_s * x
    return out_cam + out_sam


if __name__ == "__main__":
    B, C, H, W = 8, 16, 16, 16
    kernel_size = 7
    k_ch = eca_kernel_size(C)                           # = 3 for C=16, as in PyTorch

    key = jax.random.PRNGKey(0)
    kx, kw1, kw2 = jax.random.split(key, 3)
    x = jax.random.normal(kx, (B, C, H, W), dtype=jnp.float32)
    w_sp = jax.random.normal(kw1, (1, 2, kernel_size, kernel_size),
                             dtype=jnp.float32) * (2.0 / (2 * kernel_size ** 2)) ** 0.5
    w_ch = jax.random.normal(kw2, (1, 1, k_ch), dtype=jnp.float32) * (2.0 / k_ch) ** 0.5

    ref = jax.block_until_ready(_reference(x, w_sp, w_ch, kernel_size))

    # f32 I/O path (auto batch_block -> bb=4, grid=(2,)): strict check vs reference.
    out = cbam_forward(x, w_sp, w_ch, kernel_size=kernel_size)
    out = jax.block_until_ready(out)
    np.testing.assert_allclose(np.asarray(out), np.asarray(ref),
                               rtol=1e-4, atol=2e-5)

    # bf16 I/O path (half the HBM bytes, f32 compute in-kernel): loose check.
    out_bf16 = cbam_forward(x, w_sp, w_ch, kernel_size=kernel_size,
                            io_dtype=jnp.bfloat16)
    out_bf16 = jax.block_until_ready(out_bf16)
    np.testing.assert_allclose(np.asarray(out_bf16).astype(np.float32),
                               np.asarray(ref), rtol=8e-2, atol=8e-2)

    print("KERNEL_OK")
</pallas_src>

<mosaic_0001>
module attributes {stable_mosaic.version = 11 : i64} {
  func.func @_cbam_kernel(%arg0: i32, %arg1: memref<98xf32, #tpu.memory_space<smem>>, %arg2: memref<3xf32, #tpu.memory_space<smem>>, %arg3: memref<4x16x256xf32, #tpu.memory_space<vmem>>, %arg4: memref<4x16x256xf32, #tpu.memory_space<vmem>>, %arg5: memref<2x512xf32, #tpu.memory_space<vmem>>, %arg6: memref<18x1xf32, #tpu.memory_space<vmem>>) attributes {dimension_semantics = [#tpu.dimension_semantics<parallel>], iteration_bounds = array<i64: 2>, scalar_prefetch = 0 : i64, scratch_operands = 2 : i64, tpu.core_type = #tpu.core_type<tc>, window_params = [{transform_indices = @transform_0, window_bounds = array<i64: 98>}, {transform_indices = @transform_1, window_bounds = array<i64: 3>}, {transform_indices = @transform_2, window_bounds = array<i64: 4, 16, 256>}, {transform_indices = @transform_3, window_bounds = array<i64: 4, 16, 256>}]} {
    %0 = tpu.iota {dimensions = array<i32: 1>} : vector<1x256xi32>
    %c16_i32 = arith.constant 16 : i32
    %c0_i32 = arith.constant 0 : i32
    %1 = arith.cmpi eq, %c16_i32, %c0_i32 : i32
    %c1_i32 = arith.constant 1 : i32
    %2 = arith.select %1, %c1_i32, %c16_i32 : i32
    %3 = vector.broadcast %2 : i32 to vector<1x256xi32>
    %4 = arith.remsi %0, %3 : vector<1x256xi32>
    %c0_i32_0 = arith.constant 0 : i32
    %5 = vector.broadcast %c0_i32_0 : i32 to vector<1x256xi32>
    %6 = arith.cmpi ne, %4, %5 : vector<1x256xi32>
    %c0_i32_1 = arith.constant 0 : i32
    %7 = vector.broadcast %c0_i32_1 : i32 to vector<1x256xi32>
    %8 = arith.cmpi slt, %4, %7 : vector<1x256xi32>
    %c0_i32_2 = arith.constant 0 : i32
    %9 = arith.cmpi slt, %2, %c0_i32_2 : i32
    %10 = vector.broadcast %9 : i1 to vector<1x256xi1>
    %11 = vector.broadcast %10 : vector<1x256xi1> to vector<1x256xi1>
    %12 = arith.xori %8, %11 : vector<1x256xi1>
    %13 = arith.andi %12, %6 : vector<1x256xi1>
    %14 = vector.broadcast %2 : i32 to vector<1x256xi32>
    %15 = arith.addi %4, %14 : vector<1x256xi32>
    %16 = arith.select %13, %15, %4 : vector<1x256xi1>, vector<1x256xi32>
    %c-3_i32 = arith.constant -3 : i32
    %17 = vector.broadcast %c-3_i32 : i32 to vector<1x256xi32>
    %18 = arith.addi %16, %17 : vector<1x256xi32>
    %c0_i32_3 = arith.constant 0 : i32
    %19 = vector.broadcast %c0_i32_3 : i32 to vector<1x256xi32>
    %20 = arith.cmpi sge, %18, %19 : vector<1x256xi32>
    %c-3_i32_4 = arith.constant -3 : i32
    %21 = vector.broadcast %c-3_i32_4 : i32 to vector<1x256xi32>
    %22 = arith.addi %16, %21 : vector<1x256xi32>
    %c16_i32_5 = arith.constant 16 : i32
    %23 = vector.broadcast %c16_i32_5 : i32 to vector<1x256xi32>
    %24 = arith.cmpi slt, %22, %23 : vector<1x256xi32>
    %25 = arith.andi %20, %24 : vector<1x256xi1>
    %c-2_i32 = arith.constant -2 : i32
    %26 = vector.broadcast %c-2_i32 : i32 to vector<1x256xi32>
    %27 = arith.addi %16, %26 : vector<1x256xi32>
    %c0_i32_6 = arith.constant 0 : i32
    %28 = vector.broadcast %c0_i32_6 : i32 to vector<1x256xi32>
    %29 = arith.cmpi sge, %27, %28 : vector<1x256xi32>
    %c-2_i32_7 = arith.constant -2 : i32
    %30 = vector.broadcast %c-2_i32_7 : i32 to vector<1x256xi32>
    %31 = arith.addi %16, %30 : vector<1x256xi32>
    %c16_i32_8 = arith.constant 16 : i32
    %32 = vector.broadcast %c16_i32_8 : i32 to vector<1x256xi32>
    %33 = arith.cmpi slt, %31, %32 : vector<1x256xi32>
    %34 = arith.andi %29, %33 : vector<1x256xi1>
    %c-1_i32 = arith.constant -1 : i32
    %35 = vector.broadcast %c-1_i32 : i32 to vector<1x256xi32>
    %36 = arith.addi %16, %35 : vector<1x256xi32>
    %c0_i32_9 = arith.constant 0 : i32
    %37 = vector.broadcast %c0_i32_9 : i32 to vector<1x256xi32>
    %38 = arith.cmpi sge, %36, %37 : vector<1x256xi32>
    %c-1_i32_10 = arith.constant -1 : i32
    %39 = vector.broadcast %c-1_i32_10 : i32 to vector<1x256xi32>
    %40 = arith.addi %16, %39 : vector<1x256xi32>
    %c16_i32_11 = arith.constant 16 : i32
    %41 = vector.broadcast %c16_i32_11 : i32 to vector<1x256xi32>
    %42 = arith.cmpi slt, %40, %41 : vector<1x256xi32>
    %43 = arith.andi %38, %42 : vector<1x256xi1>
    %c0_i32_12 = arith.constant 0 : i32
    %44 = vector.broadcast %c0_i32_12 : i32 to vector<1x256xi32>
    %45 = arith.addi %16, %44 : vector<1x256xi32>
    %c0_i32_13 = arith.constant 0 : i32
    %46 = vector.broadcast %c0_i32_13 : i32 to vector<1x256xi32>
    %47 = arith.cmpi sge, %45, %46 : vector<1x256xi32>
    %c0_i32_14 = arith.constant 0 : i32
    %48 = vector.broadcast %c0_i32_14 : i32 to vector<1x256xi32>
    %49 = arith.addi %16, %48 : vector<1x256xi32>
    %c16_i32_15 = arith.constant 16 : i32
    %50 = vector.broadcast %c16_i32_15 : i32 to vector<1x256xi32>
    %51 = arith.cmpi slt, %49, %50 : vector<1x256xi32>
    %52 = arith.andi %47, %51 : vector<1x256xi1>
    %c1_i32_16 = arith.constant 1 : i32
    %53 = vector.broadcast %c1_i32_16 : i32 to vector<1x256xi32>
    %54 = arith.addi %16, %53 : vector<1x256xi32>
    %c0_i32_17 = arith.constant 0 : i32
    %55 = vector.broadcast %c0_i32_17 : i32 to vector<1x256xi32>
    %56 = arith.cmpi sge, %54, %55 : vector<1x256xi32>
    %c1_i32_18 = arith.constant 1 : i32
    %57 = vector.broadcast %c1_i32_18 : i32 to vector<1x256xi32>
    %58 = arith.addi %16, %57 : vector<1x256xi32>
    %c16_i32_19 = arith.constant 16 : i32
    %59 = vector.broadcast %c16_i32_19 : i32 to vector<1x256xi32>
    %60 = arith.cmpi slt, %58, %59 : vector<1x256xi32>
    %61 = arith.andi %56, %60 : vector<1x256xi1>
    %c2_i32 = arith.constant 2 : i32
    %62 = vector.broadcast %c2_i32 : i32 to vector<1x256xi32>
    %63 = arith.addi %16, %62 : vector<1x256xi32>
    %c0_i32_20 = arith.constant 0 : i32
    %64 = vector.broadcast %c0_i32_20 : i32 to vector<1x256xi32>
    %65 = arith.cmpi sge, %63, %64 : vector<1x256xi32>
    %c2_i32_21 = arith.constant 2 : i32
    %66 = vector.broadcast %c2_i32_21 : i32 to vector<1x256xi32>
    %67 = arith.addi %16, %66 : vector<1x256xi32>
    %c16_i32_22 = arith.constant 16 : i32
    %68 = vector.broadcast %c16_i32_22 : i32 to vector<1x256xi32>
    %69 = arith.cmpi slt, %67, %68 : vector<1x256xi32>
    %70 = arith.andi %65, %69 : vector<1x256xi1>
    %c3_i32 = arith.constant 3 : i32
    %71 = vector.broadcast %c3_i32 : i32 to vector<1x256xi32>
    %72 = arith.addi %16, %71 : vector<1x256xi32>
    %c0_i32_23 = arith.constant 0 : i32
    %73 = vector.broadcast %c0_i32_23 : i32 to vector<1x256xi32>
    %74 = arith.cmpi sge, %72, %73 : vector<1x256xi32>
    %c3_i32_24 = arith.constant 3 : i32
    %75 = vector.broadcast %c3_i32_24 : i32 to vector<1x256xi32>
    %76 = arith.addi %16, %75 : vector<1x256xi32>
    %c16_i32_25 = arith.constant 16 : i32
    %77 = vector.broadcast %c16_i32_25 : i32 to vector<1x256xi32>
    %78 = arith.cmpi slt, %76, %77 : vector<1x256xi32>
    %79 = arith.andi %74, %78 : vector<1x256xi1>
    %c0 = arith.constant 0 : index
    %80 = memref.load %arg1[%c0] : memref<98xf32, #tpu.memory_space<smem>>
    %c1 = arith.constant 1 : index
    %81 = memref.load %arg1[%c1] : memref<98xf32, #tpu.memory_space<smem>>
    %c2 = arith.constant 2 : index
    %82 = memref.load %arg1[%c2] : memref<98xf32, #tpu.memory_space<smem>>
    %c3 = arith.constant 3 : index
    %83 = memref.load %arg1[%c3] : memref<98xf32, #tpu.memory_space<smem>>
    %c4 = arith.constant 4 : index
    %84 = memref.load %arg1[%c4] : memref<98xf32, #tpu.memory_space<smem>>
    %c5 = arith.constant 5 : index
    %85 = memref.load %arg1[%c5] : memref<98xf32, #tpu.memory_space<smem>>
    %c6 = arith.constant 6 : index
    %86 = memref.load %arg1[%c6] : memref<98xf32, #tpu.memory_space<smem>>
    %c7 = arith.constant 7 : index
    %87 = memref.load %arg1[%c7] : memref<98xf32, #tpu.memory_space<smem>>
    %c8 = arith.constant 8 : index
    %88 = memref.load %arg1[%c8] : memref<98xf32, #tpu.memory_space<smem>>
    %c9 = arith.constant 9 : index
    %89 = memref.load %arg1[%c9] : memref<98xf32, #tpu.memory_space<smem>>
    %c10 = arith.constant 10 : index
    %90 = memref.load %arg1[%c10] : memref<98xf32, #tpu.memory_space<smem>>
    %c11 = arith.constant 11 : index
    %91 = memref.load %arg1[%c11] : memref<98xf32, #tpu.memory_space<smem>>
    %c12 = arith.constant 12 : index
    %92 = memref.load %arg1[%c12] : memref<98xf32, #tpu.memory_space<smem>>
    %c13 = arith.constant 13 : index
    %93 = memref.load %arg1[%c13] : memref<98xf32, #tpu.memory_space<smem>>
    %c14 = arith.constant 14 : index
    %94 = memref.load %arg1[%c14] : memref<98xf32, #tpu.memory_space<smem>>
    %c15 = arith.constant 15 : index
    %95 = memref.load %arg1[%c15] : memref<98xf32, #tpu.memory_space<smem>>
    %c16 = arith.constant 16 : index
    %96 = memref.load %arg1[%c16] : memref<98xf32, #tpu.memory_space<smem>>
    %c17 = arith.constant 17 : index
    %97 = memref.load %arg1[%c17] : memref<98xf32, #tpu.memory_space<smem>>
    %c18 = arith.constant 18 : index
    %98 = memref.load %arg1[%c18] : memref<98xf32, #tpu.memory_space<smem>>
    %c19 = arith.constant 19 : index
    %99 = memref.load %arg1[%c19] : memref<98xf32, #tpu.memory_space<smem>>
    %c20 = arith.constant 20 : index
    %100 = memref.load %arg1[%c20] : memref<98xf32, #tpu.memory_space<smem>>
    %c21 = arith.constant 21 : index
    %101 = memref.load %arg1[%c21] : memref<98xf32, #tpu.memory_space<smem>>
    %c22 = arith.constant 22 : index
    %102 = memref.load %arg1[%c22] : memref<98xf32, #tpu.memory_space<smem>>
    %c23 = arith.constant 23 : index
    %103 = memref.load %arg1[%c23] : memref<98xf32, #tpu.memory_space<smem>>
    %c24 = arith.constant 24 : index
    %104 = memref.load %arg1[%c24] : memref<98xf32, #tpu.memory_space<smem>>
    %c25 = arith.constant 25 : index
    %105 = memref.load %arg1[%c25] : memref<98xf32, #tpu.memory_space<smem>>
    %c26 = arith.constant 26 : index
    %106 = memref.load %arg1[%c26] : memref<98xf32, #tpu.memory_space<smem>>
    %c27 = arith.constant 27 : index
    %107 = memref.load %arg1[%c27] : memref<98xf32, #tpu.memory_space<smem>>
    %c28 = arith.constant 28 : index
    %108 = memref.load %arg1[%c28] : memref<98xf32, #tpu.memory_space<smem>>
    %c29 = arith.constant 29 : index
    %109 = memref.load %arg1[%c29] : memref<98xf32, #tpu.memory_space<smem>>
    %c30 = arith.constant 30 : index
    %110 = memref.load %arg1[%c30] : memref<98xf32, #tpu.memory_space<smem>>
    %c31 = arith.constant 31 : index
    %111 = memref.load %arg1[%c31] : memref<98xf32, #tpu.memory_space<smem>>
    %c32 = arith.constant 32 : index
    %112 = memref.load %arg1[%c32] : memref<98xf32, #tpu.memory_space<smem>>
    %c33 = arith.constant 33 : index
    %113 = memref.load %arg1[%c33] : memref<98xf32, #tpu.memory_space<smem>>
    %c34 = arith.constant 34 : index
    %114 = memref.load %arg1[%c34] : memref<98xf32, #tpu.memory_space<smem>>
    %c35 = arith.constant 35 : index
    %115 = memref.load %arg1[%c35] : memref<98xf32, #tpu.memory_space<smem>>
    %c36 = arith.constant 36 : index
    %116 = memref.load %arg1[%c36] : memref<98xf32, #tpu.memory_space<smem>>
    %c37 = arith.constant 37 : index
    %117 = memref.load %arg1[%c37] : memref<98xf32, #tpu.memory_space<smem>>
    %c38 = arith.constant 38 : index
    %118 = memref.load %arg1[%c38] : memref<98xf32, #tpu.memory_space<smem>>
    %c39 = arith.constant 39 : index
    %119 = memref.load %arg1[%c39] : memref<98xf32, #tpu.memory_space<smem>>
    %c40 = arith.constant 40 : index
    %120 = memref.load %arg1[%c40] : memref<98xf32, #tpu.memory_space<smem>>
    %c41 = arith.constant 41 : index
    %121 = memref.load %arg1[%c41] : memref<98xf32, #tpu.memory_space<smem>>
    %c42 = arith.constant 42 : index
    %122 = memref.load %arg1[%c42] : memref<98xf32, #tpu.memory_space<smem>>
    %c43 = arith.constant 43 : index
    %123 = memref.load %arg1[%c43] : memref<98xf32, #tpu.memory_space<smem>>
    %c44 = arith.constant 44 : index
    %124 = memref.load %arg1[%c44] : memref<98xf32, #tpu.memory_space<smem>>
    %c45 = arith.constant 45 : index
    %125 = memref.load %arg1[%c45] : memref<98xf32, #tpu.memory_space<smem>>
    %c46 = arith.constant 46 : index
    %126 = memref.load %arg1[%c46] : memref<98xf32, #tpu.memory_space<smem>>
    %c47 = arith.constant 47 : index
    %127 = memref.load %arg1[%c47] : memref<98xf32, #tpu.memory_space<smem>>
    %c48 = arith.constant 48 : index
    %128 = memref.load %arg1[%c48] : memref<98xf32, #tpu.memory_space<smem>>
    %c49 = arith.constant 49 : index
    %129 = memref.load %arg1[%c49] : memref<98xf32, #tpu.memory_space<smem>>
    %c50 = arith.constant 50 : index
    %130 = memref.load %arg1[%c50] : memref<98xf32, #tpu.memory_space<smem>>
    %c51 = arith.constant 51 : index
    %131 = memref.load %arg1[%c51] : memref<98xf32, #tpu.memory_space<smem>>
    %c52 = arith.constant 52 : index
    %132 = memref.load %arg1[%c52] : memref<98xf32, #tpu.memory_space<smem>>
    %c53 = arith.constant 53 : index
    %133 = memref.load %arg1[%c53] : memref<98xf32, #tpu.memory_space<smem>>
    %c54 = arith.constant 54 : index
    %134 = memref.load %arg1[%c54] : memref<98xf32, #tpu.memory_space<smem>>
    %c55 = arith.constant 55 : index
    %135 = memref.load %arg1[%c55] : memref<98xf32, #tpu.memory_space<smem>>
    %c56 = arith.constant 56 : index
    %136 = memref.load %arg1[%c56] : memref<98xf32, #tpu.memory_space<smem>>
    %c57 = arith.constant 57 : index
    %137 = memref.load %arg1[%c57] : memref<98xf32, #tpu.memory_space<smem>>
    %c58 = arith.constant 58 : index
    %138 = memref.load %arg1[%c58] : memref<98xf32, #tpu.memory_space<smem>>
    %c59 = arith.constant 59 : index
    %139 = memref.load %arg1[%c59] : memref<98xf32, #tpu.memory_space<smem>>
    %c60 = arith.constant 60 : index
    %140 = memref.load %arg1[%c60] : memref<98xf32, #tpu.memory_space<smem>>
    %c61 = arith.constant 61 : index
    %141 = memref.load %arg1[%c61] : memref<98xf32, #tpu.memory_space<smem>>
    %c62 = arith.constant 62 : index
    %142 = memref.load %arg1[%c62] : memref<98xf32, #tpu.memory_space<smem>>
    %c63 = arith.constant 63 : index
    %143 = memref.load %arg1[%c63] : memref<98xf32, #tpu.memory_space<smem>>
    %c64 = arith.constant 64 : index
    %144 = memref.load %arg1[%c64] : memref<98xf32, #tpu.memory_space<smem>>
    %c65 = arith.constant 65 : index
    %145 = memref.load %arg1[%c65] : memref<98xf32, #tpu.memory_space<smem>>
    %c66 = arith.constant 66 : index
    %146 = memref.load %arg1[%c66] : memref<98xf32, #tpu.memory_space<smem>>
    %c67 = arith.constant 67 : index
    %147 = memref.load %arg1[%c67] : memref<98xf32, #tpu.memory_space<smem>>
    %c68 = arith.constant 68 : index
    %148 = memref.load %arg1[%c68] : memref<98xf32, #tpu.memory_space<smem>>
    %c69 = arith.constant 69 : index
    %149 = memref.load %arg1[%c69] : memref<98xf32, #tpu.memory_space<smem>>
    %c70 = arith.constant 70 : index
    %150 = memref.load %arg1[%c70] : memref<98xf32, #tpu.memory_space<smem>>
    %c71 = arith.constant 71 : index
    %151 = memref.load %arg1[%c71] : memref<98xf32, #tpu.memory_space<smem>>
    %c72 = arith.constant 72 : index
    %152 = memref.load %arg1[%c72] : memref<98xf32, #tpu.memory_space<smem>>
    %c73 = arith.constant 73 : index
    %153 = memref.load %arg1[%c73] : memref<98xf32, #tpu.memory_space<smem>>
    %c74 = arith.constant 74 : index
    %154 = memref.load %arg1[%c74] : memref<98xf32, #tpu.memory_space<smem>>
    %c75 = arith.constant 75 : index
    %155 = memref.load %arg1[%c75] : memref<98xf32, #tpu.memory_space<smem>>
    %c76 = arith.constant 76 : index
    %156 = memref.load %arg1[%c76] : memref<98xf32, #tpu.memory_space<smem>>
    %c77 = arith.constant 77 : index
    %157 = memref.load %arg1[%c77] : memref<98xf32, #tpu.memory_space<smem>>
    %c78 = arith.constant 78 : index
    %158 = memref.load %arg1[%c78] : memref<98xf32, #tpu.memory_space<smem>>
    %c79 = arith.constant 79 : index
    %159 = memref.load %arg1[%c79] : memref<98xf32, #tpu.memory_space<smem>>
    %c80 = arith.constant 80 : index
    %160 = memref.load %arg1[%c80] : memref<98xf32, #tpu.memory_space<smem>>
    %c81 = arith.constant 81 : index
    %161 = memref.load %arg1[%c81] : memref<98xf32, #tpu.memory_space<smem>>
    %c82 = arith.constant 82 : index
    %162 = memref.load %arg1[%c82] : memref<98xf32, #tpu.memory_space<smem>>
    %c83 = arith.constant 83 : index
    %163 = memref.load %arg1[%c83] : memref<98xf32, #tpu.memory_space<smem>>
    %c84 = arith.constant 84 : index
    %164 = memref.load %arg1[%c84] : memref<98xf32, #tpu.memory_space<smem>>
    %c85 = arith.constant 85 : index
    %165 = memref.load %arg1[%c85] : memref<98xf32, #tpu.memory_space<smem>>
    %c86 = arith.constant 86 : index
    %166 = memref.load %arg1[%c86] : memref<98xf32, #tpu.memory_space<smem>>
    %c87 = arith.constant 87 : index
    %167 = memref.load %arg1[%c87] : memref<98xf32, #tpu.memory_space<smem>>
    %c88 = arith.constant 88 : index
    %168 = memref.load %arg1[%c88] : memref<98xf32, #tpu.memory_space<smem>>
    %c89 = arith.constant 89 : index
    %169 = memref.load %arg1[%c89] : memref<98xf32, #tpu.memory_space<smem>>
    %c90 = arith.constant 90 : index
    %170 = memref.load %arg1[%c90] : memref<98xf32, #tpu.memory_space<smem>>
    %c91 = arith.constant 91 : index
    %171 = memref.load %arg1[%c91] : memref<98xf32, #tpu.memory_space<smem>>
    %c92 = arith.constant 92 : index
    %172 = memref.load %arg1[%c92] : memref<98xf32, #tpu.memory_space<smem>>
    %c93 = arith.constant 93 : index
    %173 = memref.load %arg1[%c93] : memref<98xf32, #tpu.memory_space<smem>>
    %c94 = arith.constant 94 : index
    %174 = memref.load %arg1[%c94] : memref<98xf32, #tpu.memory_space<smem>>
    %c95 = arith.constant 95 : index
    %175 = memref.load %arg1[%c95] : memref<98xf32, #tpu.memory_space<smem>>
    %c96 = arith.constant 96 : index
    %176 = memref.load %arg1[%c96] : memref<98xf32, #tpu.memory_space<smem>>
    %c97 = arith.constant 97 : index
    %177 = memref.load %arg1[%c97] : memref<98xf32, #tpu.memory_space<smem>>
    %c0_26 = arith.constant 0 : index
    %178 = memref.load %arg2[%c0_26] : memref<3xf32, #tpu.memory_space<smem>>
    %c1_27 = arith.constant 1 : index
    %179 = memref.load %arg2[%c1_27] : memref<3xf32, #tpu.memory_space<smem>>
    %c2_28 = arith.constant 2 : index
    %180 = memref.load %arg2[%c2_28] : memref<3xf32, #tpu.memory_space<smem>>
    %cst = arith.constant 0.000000e+00 : f32
    %181 = vector.broadcast %cst : f32 to vector<2x512xf32>
    %c0_29 = arith.constant 0 : index
    %c0_30 = arith.constant 0 : index
    %182 = vector.load %arg5[%c0_29, %c0_30] : memref<2x512xf32, #tpu.memory_space<vmem>>, vector<2x512xf32>
    tpu.vector_store %arg5[%c0_29, %c0_30], %181 {strides = array<i32>} : memref<2x512xf32, #tpu.memory_space<vmem>>, vector<2x512xf32>,
    %cst_31 = arith.constant 0.000000e+00 : f32
    %183 = vector.broadcast %cst_31 : f32 to vector<18x1xf32>
    %c0_32 = arith.constant 0 : index
    %c0_33 = arith.constant 0 : index
    %184 = vector.load %arg6[%c0_32, %c0_33] : memref<18x1xf32, #tpu.memory_space<vmem>>, vector<18x1xf32>
    tpu.vector_store %arg6[%c0_32, %c0_33], %183 {strides = array<i32>} : memref<18x1xf32, #tpu.memory_space<vmem>>, vector<18x1xf32>,
    %c0_i32_34 = arith.constant 0 : i32
    %c4_i32 = arith.constant 4 : i32
    %185 = arith.addi %c0_i32_34, %c4_i32 : i32
    %c1_i32_35 = arith.constant 1 : i32
    scf.for %arg7 = %c0_i32_34 to %185 step %c1_i32_35  : i32 {
      %186 = arith.index_cast %arg7 : i32 to index
      %c0_37 = arith.constant 0 : index
      %c0_38 = arith.constant 0 : index
      %187 = vector.load %arg3[%186, %c0_37, %c0_38] : memref<4x16x256xf32, #tpu.memory_space<vmem>>, vector<1x16x256xf32>
      %188 = vector.shape_cast %187 : vector<1x16x256xf32> to vector<16x256xf32>
      %cst_39 = arith.constant dense<0.000000e+00> : vector<16xf32>
      %189 = vector.multi_reduction <add>, %188, %cst_39 [1] : vector<16x256xf32> to vector<16xf32>
      %190 = vector.shape_cast %189 : vector<16xf32> to vector<16x1xf32>
      %cst_40 = arith.constant 2.560000e+02 : f32
      %191 = vector.broadcast %cst_40 : f32 to vector<16x1xf32>
      %192 = arith.divf %190, %191 : vector<16x1xf32>
      %cst_41 = arith.constant dense<0xFF800000> : vector<16xf32>
      %193 = vector.multi_reduction <maximumf>, %188, %cst_41 [1] : vector<16x256xf32> to vector<16xf32>
      %194 = vector.shape_cast %193 : vector<16xf32> to vector<16x1xf32>
      %cst_42 = arith.constant dense<0.000000e+00> : vector<256xf32>
      %195 = vector.multi_reduction <add>, %188, %cst_42 [0] : vector<16x256xf32> to vector<256xf32>
      %196 = vector.shape_cast %195 : vector<256xf32> to vector<1x256xf32>
      %cst_43 = arith.constant 1.600000e+01 : f32
      %197 = vector.broadcast %cst_43 : f32 to vector<1x256xf32>
      %198 = arith.divf %196, %197 : vector<1x256xf32>
      %cst_44 = arith.constant dense<0xFF800000> : vector<256xf32>
      %199 = vector.multi_reduction <maximumf>, %188, %cst_44 [0] : vector<16x256xf32> to vector<256xf32>
      %200 = vector.shape_cast %199 : vector<256xf32> to vector<1x256xf32>
      %201 = arith.addf %192, %194 : vector<16x1xf32>
      %c1_45 = arith.constant 1 : index
      %c0_46 = arith.constant 0 : index
      %202 = vector.load %arg6[%c1_45, %c0_46] : memref<18x1xf32, #tpu.memory_space<vmem>>, vector<16x1xf32>
      tpu.vector_store %arg6[%c1_45, %c0_46], %201 {strides = array<i32>} : memref<18x1xf32, #tpu.memory_space<vmem>>, vector<16x1xf32>,
      %cst_47 = arith.constant 0.000000e+00 : f32
      %203 = vector.broadcast %cst_47 : f32 to vector<16x1xf32>
      %c0_48 = arith.constant 0 : index
      %c0_49 = arith.constant 0 : index
      %204 = vector.load %arg6[%c0_48, %c0_49] : memref<18x1xf32, #tpu.memory_space<vmem>>, vector<16x1xf32>
      %205 = vector.broadcast %178 : f32 to vector<16x1xf32>
      %206 = arith.mulf %204, %205 : vector<16x1xf32>
      %207 = arith.addf %203, %206 : vector<16x1xf32>
      %c1_50 = arith.constant 1 : index
      %c0_51 = arith.constant 0 : index
      %208 = vector.load %arg6[%c1_50, %c0_51] : memref<18x1xf32, #tpu.memory_space<vmem>>, vector<16x1xf32>
      %209 = vector.broadcast %179 : f32 to vector<16x1xf32>
      %210 = arith.mulf %208, %209 : vector<16x1xf32>
      %211 = arith.addf %207, %210 : vector<16x1xf32>
      %c2_52 = arith.constant 2 : index
      %c0_53 = arith.constant 0 : index
      %212 = vector.load %arg6[%c2_52, %c0_53] : memref<18x1xf32, #tpu.memory_space<vmem>>, vector<16x1xf32>
      %213 = vector.broadcast %180 : f32 to vector<16x1xf32>
      %214 = arith.mulf %212, %213 : vector<16x1xf32>
      %215 = arith.addf %211, %214 : vector<16x1xf32>
      %216 = arith.negf %215 : vector<16x1xf32>
      %217 = math.exp %216 : vector<16x1xf32>
      %cst_54 = arith.constant 1.000000e+00 : f32
      %218 = vector.broadcast %cst_54 : f32 to vector<16x1xf32>
      %219 = arith.addf %218, %217 : vector<16x1xf32>
      %220 = arith.divf %218, %219 : vector<16x1xf32>
      %c0_55 = arith.constant 0 : index
      %c128 = arith.constant 128 : index
      %221 = vector.load %arg5[%c0_55, %c128] : memref<2x512xf32, #tpu.memory_space<vmem>>, vector<1x256xf32>
      tpu.vector_store %arg5[%c0_55, %c128], %198 {strides = array<i32>} : memref<2x512xf32, #tpu.memory_space<vmem>>, vector<1x256xf32>,
      %c1_56 = arith.constant 1 : index
      %c128_57 = arith.constant 128 : index
      %222 = vector.load %arg5[%c1_56, %c128_57] : memref<2x512xf32, #tpu.memory_space<vmem>>, vector<1x256xf32>
      tpu.vector_store %arg5[%c1_56, %c128_57], %200 {strides = array<i32>} : memref<2x512xf32, #tpu.memory_space<vmem>>, vector<1x256xf32>,
      %cst_58 = arith.constant 0.000000e+00 : f32
      %223 = vector.broadcast %cst_58 : f32 to vector<1x262xf32>
      %cst_59 = arith.constant 0.000000e+00 : f32
      %224 = vector.broadcast %cst_59 : f32 to vector<1x262xf32>
      %cst_60 = arith.constant 0.000000e+00 : f32
      %225 = vector.broadcast %cst_60 : f32 to vector<1x262xf32>
      %cst_61 = arith.constant 0.000000e+00 : f32
      %226 = vector.broadcast %cst_61 : f32 to vector<1x262xf32>
      %cst_62 = arith.constant 0.000000e+00 : f32
      %227 = vector.broadcast %cst_62 : f32 to vector<1x262xf32>
      %cst_63 = arith.constant 0.000000e+00 : f32
      %228 = vector.broadcast %cst_63 : f32 to vector<1x262xf32>
      %cst_64 = arith.constant 0.000000e+00 : f32
      %229 = vector.broadcast %cst_64 : f32 to vector<1x262xf32>
      %c0_65 = arith.constant 0 : index
      %c77_66 = arith.constant 77 : index
      %230 = vector.load %arg5[%c0_65, %c77_66] : memref<2x512xf32, #tpu.memory_space<vmem>>, vector<1x262xf32>
      %231 = vector.broadcast %80 : f32 to vector<1x262xf32>
      %232 = arith.mulf %230, %231 : vector<1x262xf32>
      %233 = arith.addf %223, %232 : vector<1x262xf32>
      %234 = vector.broadcast %81 : f32 to vector<1x262xf32>
      %235 = arith.mulf %230, %234 : vector<1x262xf32>
      %236 = arith.addf %224, %235 : vector<1x262xf32>
      %237 = vector.broadcast %82 : f32 to vector<1x262xf32>
      %238 = arith.mulf %230, %237 : vector<1x262xf32>
      %239 = arith.addf %225, %238 : vector<1x262xf32>
      %240 = vector.broadcast %83 : f32 to vector<1x262xf32>
      %241 = arith.mulf %230, %240 : vector<1x262xf32>
      %242 = arith.addf %226, %241 : vector<1x262xf32>
      %243 = vector.broadcast %84 : f32 to vector<1x262xf32>
      %244 = arith.mulf %230, %243 : vector<1x262xf32>
      %245 = arith.addf %227, %244 : vector<1x262xf32>
      %246 = vector.broadcast %85 : f32 to vector<1x262xf32>
      %247 = arith.mulf %230, %246 : vector<1x262xf32>
      %248 = arith.addf %228, %247 : vector<1x262xf32>
      %249 = vector.broadcast %86 : f32 to vector<1x262xf32>
      %250 = arith.mulf %230, %249 : vector<1x262xf32>
      %251 = arith.addf %229, %250 : vector<1x262xf32>
      %c0_67 = arith.constant 0 : index
      %c93_68 = arith.constant 93 : index
      %252 = vector.load %arg5[%c0_67, %c93_68] : memref<2x512xf32, #tpu.memory_space<vmem>>, vector<1x262xf32>
      %253 = vector.broadcast %87 : f32 to vector<1x262xf32>
      %254 = arith.mulf %252, %253 : vector<1x262xf32>
      %255 = arith.addf %233, %254 : vector<1x262xf32>
      %256 = vector.broadcast %88 : f32 to vector<1x262xf32>
      %257 = arith.mulf %252, %256 : vector<1x262xf32>
      %258 = arith.addf %236, %257 : vector<1x262xf32>
      %259 = vector.broadcast %89 : f32 to vector<1x262xf32>
      %260 = arith.mulf %252, %259 : vector<1x262xf32>
      %261 = arith.addf %239, %260 : vector<1x262xf32>
      %262 = vector.broadcast %90 : f32 to vector<1x262xf32>
      %263 = arith.mulf %252, %262 : vector<1x262xf32>
      %264 = arith.addf %242, %263 : vector<1x262xf32>
      %265 = vector.broadcast %91 : f32 to vector<1x262xf32>
      %266 = arith.mulf %252, %265 : vector<1x262xf32>
      %267 = arith.addf %245, %266 : vector<1x262xf32>
      %268 = vector.broadcast %92 : f32 to vector<1x262xf32>
      %269 = arith.mulf %252, %268 : vector<1x262xf32>
      %270 = arith.addf %248, %269 : vector<1x262xf32>
      %271 = vector.broadcast %93 : f32 to vector<1x262xf32>
      %272 = arith.mulf %252, %271 : vector<1x262xf32>
      %273 = arith.addf %251, %272 : vector<1x262xf32>
      %c0_69 = arith.constant 0 : index
      %c109 = arith.constant 109 : index
      %274 = vector.load %arg5[%c0_69, %c109] : memref<2x512xf32, #tpu.memory_space<vmem>>, vector<1x262xf32>
      %275 = vector.broadcast %94 : f32 to vector<1x262xf32>
      %276 = arith.mulf %274, %275 : vector<1x262xf32>
      %277 = arith.addf %255, %276 : vector<1x262xf32>
      %278 = vector.broadcast %95 : f32 to vector<1x262xf32>
      %279 = arith.mulf %274, %278 : vector<1x262xf32>
      %280 = arith.addf %258, %279 : vector<1x262xf32>
      %281 = vector.broadcast %96 : f32 to vector<1x262xf32>
      %282 = arith.mulf %274, %281 : vector<1x262xf32>
      %283 = arith.addf %261, %282 : vector<1x262xf32>
      %284 = vector.broadcast %97 : f32 to vector<1x262xf32>
      %285 = arith.mulf %274, %284 : vector<1x262xf32>
      %286 = arith.addf %264, %285 : vector<1x262xf32>
      %287 = vector.broadcast %98 : f32 to vector<1x262xf32>
      %288 = arith.mulf %274, %287 : vector<1x262xf32>
      %289 = arith.addf %267, %288 : vector<1x262xf32>
      %290 = vector.broadcast %99 : f32 to vector<1x262xf32>
      %291 = arith.mulf %274, %290 : vector<1x262xf32>
      %292 = arith.addf %270, %291 : vector<1x262xf32>
      %293 = vector.broadcast %100 : f32 to vector<1x262xf32>
      %294 = arith.mulf %274, %293 : vector<1x262xf32>
      %295 = arith.addf %273, %294 : vector<1x262xf32>
      %c0_70 = arith.constant 0 : index
      %c125 = arith.constant 125 : index
      %296 = vector.load %arg5[%c0_70, %c125] : memref<2x512xf32, #tpu.memory_space<vmem>>, vector<1x262xf32>
      %297 = vector.broadcast %101 : f32 to vector<1x262xf32>
      %298 = arith.mulf %296, %297 : vector<1x262xf32>
      %299 = arith.addf %277, %298 : vector<1x262xf32>
      %300 = vector.broadcast %102 : f32 to vector<1x262xf32>
      %301 = arith.mulf %296, %300 : vector<1x262xf32>
      %302 = arith.addf %280, %301 : vector<1x262xf32>
      %303 = vector.broadcast %103 : f32 to vector<1x262xf32>
      %304 = arith.mulf %296, %303 : vector<1x262xf32>
      %305 = arith.addf %283, %304 : vector<1x262xf32>
      %306 = vector.broadcast %104 : f32 to vector<1x262xf32>
      %307 = arith.mulf %296, %306 : vector<1x262xf32>
      %308 = arith.addf %286, %307 : vector<1x262xf32>
      %309 = vector.broadcast %105 : f32 to vector<1x262xf32>
      %310 = arith.mulf %296, %309 : vector<1x262xf32>
      %311 = arith.addf %289, %310 : vector<1x262xf32>
      %312 = vector.broadcast %106 : f32 to vector<1x262xf32>
      %313 = arith.mulf %296, %312 : vector<1x262xf32>
      %314 = arith.addf %292, %313 : vector<1x262xf32>
      %315 = vector.broadcast %107 : f32 to vector<1x262xf32>
      %316 = arith.mulf %296, %315 : vector<1x262xf32>
      %317 = arith.addf %295, %316 : vector<1x262xf32>
      %c0_71 = arith.constant 0 : index
      %c141 = arith.constant 141 : index
      %318 = vector.load %arg5[%c0_71, %c141] : memref<2x512xf32, #tpu.memory_space<vmem>>, vector<1x262xf32>
      %319 = vector.broadcast %108 : f32 to vector<1x262xf32>
      %320 = arith.mulf %318, %319 : vector<1x262xf32>
      %321 = arith.addf %299, %320 : vector<1x262xf32>
      %322 = vector.broadcast %109 : f32 to vector<1x262xf32>
      %323 = arith.mulf %318, %322 : vector<1x262xf32>
      %324 = arith.addf %302, %323 : vector<1x262xf32>
      %325 = vector.broadcast %110 : f32 to vector<1x262xf32>
      %326 = arith.mulf %318, %325 : vector<1x262xf32>
      %327 = arith.addf %305, %326 : vector<1x262xf32>
      %328 = vector.broadcast %111 : f32 to vector<1x262xf32>
      %329 = arith.mulf %318, %328 : vector<1x262xf32>
      %330 = arith.addf %308, %329 : vector<1x262xf32>
      %331 = vector.broadcast %112 : f32 to vector<1x262xf32>
      %332 = arith.mulf %318, %331 : vector<1x262xf32>
      %333 = arith.addf %311, %332 : vector<1x262xf32>
      %334 = vector.broadcast %113 : f32 to vector<1x262xf32>
      %335 = arith.mulf %318, %334 : vector<1x262xf32>
      %336 = arith.addf %314, %335 : vector<1x262xf32>
      %337 = vector.broadcast %114 : f32 to vector<1x262xf32>
      %338 = arith.mulf %318, %337 : vector<1x262xf32>
      %339 = arith.addf %317, %338 : vector<1x262xf32>
      %c0_72 = arith.constant 0 : index
      %c157 = arith.constant 157 : index
      %340 = vector.load %arg5[%c0_72, %c157] : memref<2x512xf32, #tpu.memory_space<vmem>>, vector<1x262xf32>
      %341 = vector.broadcast %115 : f32 to vector<1x262xf32>
      %342 = arith.mulf %340, %341 : vector<1x262xf32>
      %343 = arith.addf %321, %342 : vector<1x262xf32>
      %344 = vector.broadcast %116 : f32 to vector<1x262xf32>
      %345 = arith.mulf %340, %344 : vector<1x262xf32>
      %346 = arith.addf %324, %345 : vector<1x262xf32>
      %347 = vector.broadcast %117 : f32 to vector<1x262xf32>
      %348 = arith.mulf %340, %347 : vector<1x262xf32>
      %349 = arith.addf %327, %348 : vector<1x262xf32>
      %350 = vector.broadcast %118 : f32 to vector<1x262xf32>
      %351 = arith.mulf %340, %350 : vector<1x262xf32>
      %352 = arith.addf %330, %351 : vector<1x262xf32>
      %353 = vector.broadcast %119 : f32 to vector<1x262xf32>
      %354 = arith.mulf %340, %353 : vector<1x262xf32>
      %355 = arith.addf %333, %354 : vector<1x262xf32>
      %356 = vector.broadcast %120 : f32 to vector<1x262xf32>
      %357 = arith.mulf %340, %356 : vector<1x262xf32>
      %358 = arith.addf %336, %357 : vector<1x262xf32>
      %359 = vector.broadcast %121 : f32 to vector<1x262xf32>
      %360 = arith.mulf %340, %359 : vector<1x262xf32>
      %361 = arith.addf %339, %360 : vector<1x262xf32>
      %c0_73 = arith.constant 0 : index
      %c173 = arith.constant 173 : index
      %362 = vector.load %arg5[%c0_73, %c173] : memref<2x512xf32, #tpu.memory_space<vmem>>, vector<1x262xf32>
      %363 = vector.broadcast %122 : f32 to vector<1x262xf32>
      %364 = arith.mulf %362, %363 : vector<1x262xf32>
      %365 = arith.addf %343, %364 : vector<1x262xf32>
      %366 = vector.broadcast %123 : f32 to vector<1x262xf32>
      %367 = arith.mulf %362, %366 : vector<1x262xf32>
      %368 = arith.addf %346, %367 : vector<1x262xf32>
      %369 = vector.broadcast %124 : f32 to vector<1x262xf32>
      %370 = arith.mulf %362, %369 : vector<1x262xf32>
      %371 = arith.addf %349, %370 : vector<1x262xf32>
      %372 = vector.broadcast %125 : f32 to vector<1x262xf32>
      %373 = arith.mulf %362, %372 : vector<1x262xf32>
      %374 = arith.addf %352, %373 : vector<1x262xf32>
      %375 = vector.broadcast %126 : f32 to vector<1x262xf32>
      %376 = arith.mulf %362, %375 : vector<1x262xf32>
      %377 = arith.addf %355, %376 : vector<1x262xf32>
      %378 = vector.broadcast %127 : f32 to vector<1x262xf32>
      %379 = arith.mulf %362, %378 : vector<1x262xf32>
      %380 = arith.addf %358, %379 : vector<1x262xf32>
      %381 = vector.broadcast %128 : f32 to vector<1x262xf32>
      %382 = arith.mulf %362, %381 : vector<1x262xf32>
      %383 = arith.addf %361, %382 : vector<1x262xf32>
      %c1_74 = arith.constant 1 : index
      %c77_75 = arith.constant 77 : index
      %384 = vector.load %arg5[%c1_74, %c77_75] : memref<2x512xf32, #tpu.memory_space<vmem>>, vector<1x262xf32>
      %385 = vector.broadcast %129 : f32 to vector<1x262xf32>
      %386 = arith.mulf %384, %385 : vector<1x262xf32>
      %387 = arith.addf %365, %386 : vector<1x262xf32>
      %388 = vector.broadcast %130 : f32 to vector<1x262xf32>
      %389 = arith.mulf %384, %388 : vector<1x262xf32>
      %390 = arith.addf %368, %389 : vector<1x262xf32>
      %391 = vector.broadcast %131 : f32 to vector<1x262xf32>
      %392 = arith.mulf %384, %391 : vector<1x262xf32>
      %393 = arith.addf %371, %392 : vector<1x262xf32>
      %394 = vector.broadcast %132 : f32 to vector<1x262xf32>
      %395 = arith.mulf %384, %394 : vector<1x262xf32>
      %396 = arith.addf %374, %395 : vector<1x262xf32>
      %397 = vector.broadcast %133 : f32 to vector<1x262xf32>
      %398 = arith.mulf %384, %397 : vector<1x262xf32>
      %399 = arith.addf %377, %398 : vector<1x262xf32>
      %400 = vector.broadcast %134 : f32 to vector<1x262xf32>
      %401 = arith.mulf %384, %400 : vector<1x262xf32>
      %402 = arith.addf %380, %401 : vector<1x262xf32>
      %403 = vector.broadcast %135 : f32 to vector<1x262xf32>
      %404 = arith.mulf %384, %403 : vector<1x262xf32>
      %405 = arith.addf %383, %404 : vector<1x262xf32>
      %c1_76 = arith.constant 1 : index
      %c93_77 = arith.constant 93 : index
      %406 = vector.load %arg5[%c1_76, %c93_77] : memref<2x512xf32, #tpu.memory_space<vmem>>, vector<1x262xf32>
      %407 = vector.broadcast %136 : f32 to vector<1x262xf32>
      %408 = arith.mulf %406, %407 : vector<1x262xf32>
      %409 = arith.addf %387, %408 : vector<1x262xf32>
      %410 = vector.broadcast %137 : f32 to vector<1x262xf32>
      %411 = arith.mulf %406, %410 : vector<1x262xf32>
      %412 = arith.addf %390, %411 : vector<1x262xf32>
      %413 = vector.broadcast %138 : f32 to vector<1x262xf32>
      %414 = arith.mulf %406, %413 : vector<1x262xf32>
      %415 = arith.addf %393, %414 : vector<1x262xf32>
      %416 = vector.broadcast %139 : f32 to vector<1x262xf32>
      %417 = arith.mulf %406, %416 : vector<1x262xf32>
      %418 = arith.addf %396, %417 : vector<1x262xf32>
      %419 = vector.broadcast %140 : f32 to vector<1x262xf32>
      %420 = arith.mulf %406, %419 : vector<1x262xf32>
      %421 = arith.addf %399, %420 : vector<1x262xf32>
      %422 = vector.broadcast %141 : f32 to vector<1x262xf32>
      %423 = arith.mulf %406, %422 : vector<1x262xf32>
      %424 = arith.addf %402, %423 : vector<1x262xf32>
      %425 = vector.broadcast %142 : f32 to vector<1x262xf32>
      %426 = arith.mulf %406, %425 : vector<1x262xf32>
      %427 = arith.addf %405, %426 : vector<1x262xf32>
      %c1_78 = arith.constant 1 : index
      %c109_79 = arith.constant 109 : index
      %428 = vector.load %arg5[%c1_78, %c109_79] : memref<2x512xf32, #tpu.memory_space<vmem>>, vector<1x262xf32>
      %429 = vector.broadcast %143 : f32 to vector<1x262xf32>
      %430 = arith.mulf %428, %429 : vector<1x262xf32>
      %431 = arith.addf %409, %430 : vector<1x262xf32>
      %432 = vector.broadcast %144 : f32 to vector<1x262xf32>
      %433 = arith.mulf %428, %432 : vector<1x262xf32>
      %434 = arith.addf %412, %433 : vector<1x262xf32>
      %435 = vector.broadcast %145 : f32 to vector<1x262xf32>
      %436 = arith.mulf %428, %435 : vector<1x262xf32>
      %437 = arith.addf %415, %436 : vector<1x262xf32>
      %438 = vector.broadcast %146 : f32 to vector<1x262xf32>
      %439 = arith.mulf %428, %438 : vector<1x262xf32>
      %440 = arith.addf %418, %439 : vector<1x262xf32>
      %441 = vector.broadcast %147 : f32 to vector<1x262xf32>
      %442 = arith.mulf %428, %441 : vector<1x262xf32>
      %443 = arith.addf %421, %442 : vector<1x262xf32>
      %444 = vector.broadcast %148 : f32 to vector<1x262xf32>
      %445 = arith.mulf %428, %444 : vector<1x262xf32>
      %446 = arith.addf %424, %445 : vector<1x262xf32>
      %447 = vector.broadcast %149 : f32 to vector<1x262xf32>
      %448 = arith.mulf %428, %447 : vector<1x262xf32>
      %449 = arith.addf %427, %448 : vector<1x262xf32>
      %c1_80 = arith.constant 1 : index
      %c125_81 = arith.constant 125 : index
      %450 = vector.load %arg5[%c1_80, %c125_81] : memref<2x512xf32, #tpu.memory_space<vmem>>, vector<1x262xf32>
      %451 = vector.broadcast %150 : f32 to vector<1x262xf32>
      %452 = arith.mulf %450, %451 : vector<1x262xf32>
      %453 = arith.addf %431, %452 : vector<1x262xf32>
      %454 = vector.broadcast %151 : f32 to vector<1x262xf32>
      %455 = arith.mulf %450, %454 : vector<1x262xf32>
      %456 = arith.addf %434, %455 : vector<1x262xf32>
      %457 = vector.broadcast %152 : f32 to vector<1x262xf32>
      %458 = arith.mulf %450, %457 : vector<1x262xf32>
      %459 = arith.addf %437, %458 : vector<1x262xf32>
      %460 = vector.broadcast %153 : f32 to vector<1x262xf32>
      %461 = arith.mulf %450, %460 : vector<1x262xf32>
      %462 = arith.addf %440, %461 : vector<1x262xf32>
      %463 = vector.broadcast %154 : f32 to vector<1x262xf32>
      %464 = arith.mulf %450, %463 : vector<1x262xf32>
      %465 = arith.addf %443, %464 : vector<1x262xf32>
      %466 = vector.broadcast %155 : f32 to vector<1x262xf32>
      %467 = arith.mulf %450, %466 : vector<1x262xf32>
      %468 = arith.addf %446, %467 : vector<1x262xf32>
      %469 = vector.broadcast %156 : f32 to vector<1x262xf32>
      %470 = arith.mulf %450, %469 : vector<1x262xf32>
      %471 = arith.addf %449, %470 : vector<1x262xf32>
      %c1_82 = arith.constant 1 : index
      %c141_83 = arith.constant 141 : index
      %472 = vector.load %arg5[%c1_82, %c141_83] : memref<2x512xf32, #tpu.memory_space<vmem>>, vector<1x262xf32>
      %473 = vector.broadcast %157 : f32 to vector<1x262xf32>
      %474 = arith.mulf %472, %473 : vector<1x262xf32>
      %475 = arith.addf %453, %474 : vector<1x262xf32>
      %476 = vector.broadcast %158 : f32 to vector<1x262xf32>
      %477 = arith.mulf %472, %476 : vector<1x262xf32>
      %478 = arith.addf %456, %477 : vector<1x262xf32>
      %479 = vector.broadcast %159 : f32 to vector<1x262xf32>
      %480 = arith.mulf %472, %479 : vector<1x262xf32>
      %481 = arith.addf %459, %480 : vector<1x262xf32>
      %482 = vector.broadcast %160 : f32 to vector<1x262xf32>
      %483 = arith.mulf %472, %482 : vector<1x262xf32>
      %484 = arith.addf %462, %483 : vector<1x262xf32>
      %485 = vector.broadcast %161 : f32 to vector<1x262xf32>
      %486 = arith.mulf %472, %485 : vector<1x262xf32>
      %487 = arith.addf %465, %486 : vector<1x262xf32>
      %488 = vector.broadcast %162 : f32 to vector<1x262xf32>
      %489 = arith.mulf %472, %488 : vector<1x262xf32>
      %490 = arith.addf %468, %489 : vector<1x262xf32>
      %491 = vector.broadcast %163 : f32 to vector<1x262xf32>
      %492 = arith.mulf %472, %491 : vector<1x262xf32>
      %493 = arith.addf %471, %492 : vector<1x262xf32>
      %c1_84 = arith.constant 1 : index
      %c157_85 = arith.constant 157 : index
      %494 = vector.load %arg5[%c1_84, %c157_85] : memref<2x512xf32, #tpu.memory_space<vmem>>, vector<1x262xf32>
      %495 = vector.broadcast %164 : f32 to vector<1x262xf32>
      %496 = arith.mulf %494, %495 : vector<1x262xf32>
      %497 = arith.addf %475, %496 : vector<1x262xf32>
      %498 = vector.broadcast %165 : f32 to vector<1x262xf32>
      %499 = arith.mulf %494, %498 : vector<1x262xf32>
      %500 = arith.addf %478, %499 : vector<1x262xf32>
      %501 = vector.broadcast %166 : f32 to vector<1x262xf32>
      %502 = arith.mulf %494, %501 : vector<1x262xf32>
      %503 = arith.addf %481, %502 : vector<1x262xf32>
      %504 = vector.broadcast %167 : f32 to vector<1x262xf32>
      %505 = arith.mulf %494, %504 : vector<1x262xf32>
      %506 = arith.addf %484, %505 : vector<1x262xf32>
      %507 = vector.broadcast %168 : f32 to vector<1x262xf32>
      %508 = arith.mulf %494, %507 : vector<1x262xf32>
      %509 = arith.addf %487, %508 : vector<1x262xf32>
      %510 = vector.broadcast %169 : f32 to vector<1x262xf32>
      %511 = arith.mulf %494, %510 : vector<1x262xf32>
      %512 = arith.addf %490, %511 : vector<1x262xf32>
      %513 = vector.broadcast %170 : f32 to vector<1x262xf32>
      %514 = arith.mulf %494, %513 : vector<1x262xf32>
      %515 = arith.addf %493, %514 : vector<1x262xf32>
      %c1_86 = arith.constant 1 : index
      %c173_87 = arith.constant 173 : index
      %516 = vector.load %arg5[%c1_86, %c173_87] : memref<2x512xf32, #tpu.memory_space<vmem>>, vector<1x262xf32>
      %517 = vector.broadcast %171 : f32 to vector<1x262xf32>
      %518 = arith.mulf %516, %517 : vector<1x262xf32>
      %519 = arith.addf %497, %518 : vector<1x262xf32>
      %520 = vector.broadcast %172 : f32 to vector<1x262xf32>
      %521 = arith.mulf %516, %520 : vector<1x262xf32>
      %522 = arith.addf %500, %521 : vector<1x262xf32>
      %523 = vector.broadcast %173 : f32 to vector<1x262xf32>
      %524 = arith.mulf %516, %523 : vector<1x262xf32>
      %525 = arith.addf %503, %524 : vector<1x262xf32>
      %526 = vector.broadcast %174 : f32 to vector<1x262xf32>
      %527 = arith.mulf %516, %526 : vector<1x262xf32>
      %528 = arith.addf %506, %527 : vector<1x262xf32>
      %529 = vector.broadcast %175 : f32 to vector<1x262xf32>
      %530 = arith.mulf %516, %529 : vector<1x262xf32>
      %531 = arith.addf %509, %530 : vector<1x262xf32>
      %532 = vector.broadcast %176 : f32 to vector<1x262xf32>
      %533 = arith.mulf %516, %532 : vector<1x262xf32>
      %534 = arith.addf %512, %533 : vector<1x262xf32>
      %535 = vector.broadcast %177 : f32 to vector<1x262xf32>
      %536 = arith.mulf %516, %535 : vector<1x262xf32>
      %537 = arith.addf %515, %536 : vector<1x262xf32>
      %cst_88 = arith.constant 0.000000e+00 : f32
      %538 = vector.broadcast %cst_88 : f32 to vector<1x256xf32>
      %539 = vector.extract_strided_slice %519 {offsets = [0, 0], sizes = [1, 256], strides = [1, 1]} : vector<1x262xf32> to vector<1x256xf32>
      %cst_89 = arith.constant 0.000000e+00 : f32
      %540 = vector.broadcast %cst_89 : f32 to vector<1x256xf32>
      %541 = arith.select %25, %539, %540 : vector<1x256xi1>, vector<1x256xf32>
      %542 = arith.addf %538, %541 : vector<1x256xf32>
      %543 = vector.extract_strided_slice %522 {offsets = [0, 1], sizes = [1, 256], strides = [1, 1]} : vector<1x262xf32> to vector<1x256xf32>
      %cst_90 = arith.constant 0.000000e+00 : f32
      %544 = vector.broadcast %cst_90 : f32 to vector<1x256xf32>
      %545 = arith.select %34, %543, %544 : vector<1x256xi1>, vector<1x256xf32>
      %546 = arith.addf %542, %545 : vector<1x256xf32>
      %547 = vector.extract_strided_slice %525 {offsets = [0, 2], sizes = [1, 256], strides = [1, 1]} : vector<1x262xf32> to vector<1x256xf32>
      %cst_91 = arith.constant 0.000000e+00 : f32
      %548 = vector.broadcast %cst_91 : f32 to vector<1x256xf32>
      %549 = arith.select %43, %547, %548 : vector<1x256xi1>, vector<1x256xf32>
      %550 = arith.addf %546, %549 : vector<1x256xf32>
      %551 = vector.extract_strided_slice %528 {offsets = [0, 3], sizes = [1, 256], strides = [1, 1]} : vector<1x262xf32> to vector<1x256xf32>
      %cst_92 = arith.constant 0.000000e+00 : f32
      %552 = vector.broadcast %cst_92 : f32 to vector<1x256xf32>
      %553 = arith.select %52, %551, %552 : vector<1x256xi1>, vector<1x256xf32>
      %554 = arith.addf %550, %553 : vector<1x256xf32>
      %555 = vector.extract_strided_slice %531 {offsets = [0, 4], sizes = [1, 256], strides = [1, 1]} : vector<1x262xf32> to vector<1x256xf32>
      %cst_93 = arith.constant 0.000000e+00 : f32
      %556 = vector.broadcast %cst_93 : f32 to vector<1x256xf32>
      %557 = arith.select %61, %555, %556 : vector<1x256xi1>, vector<1x256xf32>
      %558 = arith.addf %554, %557 : vector<1x256xf32>
      %559 = vector.extract_strided_slice %534 {offsets = [0, 5], sizes = [1, 256], strides = [1, 1]} : vector<1x262xf32> to vector<1x256xf32>
      %cst_94 = arith.constant 0.000000e+00 : f32
      %560 = vector.broadcast %cst_94 : f32 to vector<1x256xf32>
      %561 = arith.select %70, %559, %560 : vector<1x256xi1>, vector<1x256xf32>
      %562 = arith.addf %558, %561 : vector<1x256xf32>
      %563 = vector.extract_strided_slice %537 {offsets = [0, 6], sizes = [1, 256], strides = [1, 1]} : vector<1x262xf32> to vector<1x256xf32>
      %cst_95 = arith.constant 0.000000e+00 : f32
      %564 = vector.broadcast %cst_95 : f32 to vector<1x256xf32>
      %565 = arith.select %79, %563, %564 : vector<1x256xi1>, vector<1x256xf32>
      %566 = arith.addf %562, %565 : vector<1x256xf32>
      %567 = arith.negf %566 : vector<1x256xf32>
      %568 = math.exp %567 : vector<1x256xf32>
      %cst_96 = arith.constant 1.000000e+00 : f32
      %569 = vector.broadcast %cst_96 : f32 to vector<1x256xf32>
      %570 = arith.addf %569, %568 : vector<1x256xf32>
      %571 = arith.divf %569, %570 : vector<1x256xf32>
      %572 = arith.index_cast %arg7 : i32 to index
      %c0_97 = arith.constant 0 : index
      %c0_98 = arith.constant 0 : index
      %573 = vector.load %arg3[%572, %c0_97, %c0_98] : memref<4x16x256xf32, #tpu.memory_space<vmem>>, vector<1x16x256xf32>
      %574 = vector.shape_cast %573 : vector<1x16x256xf32> to vector<16x256xf32>
      %575 = vector.broadcast %220 : vector<16x1xf32> to vector<16x256xf32>
      %576 = arith.mulf %574, %575 : vector<16x256xf32>
      %577 = arith.mulf %576, %574 : vector<16x256xf32>
      %578 = vector.broadcast %571 : vector<1x256xf32> to vector<16x256xf32>
      %579 = arith.mulf %578, %574 : vector<16x256xf32>
      %580 = arith.addf %577, %579 : vector<16x256xf32>
      %581 = arith.index_cast %arg7 : i32 to index
      %c0_99 = arith.constant 0 : index
      %c0_100 = arith.constant 0 : index
      %582 = vector.load %arg4[%581, %c0_99, %c0_100] : memref<4x16x256xf32, #tpu.memory_space<vmem>>, vector<1x16x256xf32>
      %583 = vector.shape_cast %582 : vector<1x16x256xf32> to vector<16x256xf32>
      %584 = vector.shape_cast %580 : vector<16x256xf32> to vector<1x16x256xf32>
      tpu.vector_store %arg4[%581, %c0_99, %c0_100], %584 {strides = array<i32>} : memref<4x16x256xf32, #tpu.memory_space<vmem>>, vector<1x16x256xf32>,
    }
    %c4_i32_36 = arith.constant 4 : i32
    return
  }
  func.func @transform_0(%arg0: i32) -> i32 {
    %c0_i32 = arith.constant 0 : i32
    %c0_i32_0 = arith.constant 0 : i32
    return %c0_i32 : i32
  }
  func.func @transform_1(%arg0: i32) -> i32 {
    %c0_i32 = arith.constant 0 : i32
    %c0_i32_0 = arith.constant 0 : i32
    return %c0_i32 : i32
  }
  func.func @transform_2(%arg0: i32) -> (i32, i32, i32) {
    %c0_i32 = arith.constant 0 : i32
    %c0_i32_0 = arith.constant 0 : i32
    %c0_i32_1 = arith.constant 0 : i32
    return %arg0, %c0_i32, %c0_i32_0 : i32, i32, i32
  }
  func.func @transform_3(%arg0: i32) -> (i32, i32, i32) {
    %c0_i32 = arith.constant 0 : i32
    %c0_i32_0 = arith.constant 0 : i32
    %c0_i32_1 = arith.constant 0 : i32
    return %arg0, %c0_i32, %c0_i32_0 : i32, i32, i32
  }
}

</mosaic_0001>

<bundles_post_ra>
// kernel: tpu_custom_call.1
= control target key start
LH: loop header
LB: loop body
LE: loop exit
PB: predicated region body
PF: predicated region fallthrough
CT: control target
= control target key end

     0   :  { %s3228_s0 = inlined_call_operand.hbm [shape: f32[98], index: 0, kind: input, shape index: {}]   ;;  %s3229_s1 = inlined_call_operand.vmem [shape: f32[3], index: 1, kind: input, shape index: {}]   ;;  %s3230_s2 = inlined_call_operand.hbm [shape: f32[8,16,256], index: 2, kind: input, shape index: {}]   ;;  %s3231_s3 = inlined_call_operand.hbm [shape: f32[8,16,256], index: 3, kind: output, shape index: {}]  }
   0x1   :  { %3263 = sst [smem:[#allocation116_spill]] %s3228_s0 }
   0x2   :  { %3264 = sst [smem:[#allocation117_spill]] %s3229_s1 }
   0x3   :  { %3265 = sst [smem:[#allocation118_spill]] %s3230_s2 }
   0x4   :  { %3266 = sst [smem:[#allocation119_spill]] %s3231_s3 }
   0x5   :  { %8 = vsyncpa [#allocation7], 0 }
   0x6   :  { %9 = vsyncpa [#allocation8], 0 }
   0x7   :  { %10 = vsyncpa [#allocation5], 0 }
   0x8   :  { %12 = vsyncpa [#allocation5 + $0x1], 0 }
   0x9   :  { %13 = vsyncpa [#allocation6], 0 }
   0xa   :  { %15 = vsyncpa [#allocation6 + $0x1], 0  ;;  %s2161_s12 = smov 0   ;;  %s2163_s13 = smov 0  }
   0xb   :  { %s2165_s14 = smov 0   ;;  %s2167_s15 = smov 0  }
   0xc LB: > { %3267 = sst [smem:[#allocation16_spill]] %s2100_s12  ;;  %s2182_s16 = sadd.s32 4294967295, %s2112_s15   ;;  %s2112_s15 = sphi %s2167_s15, %s3495_s15   ;;  %s2108_s14 = sphi %s2165_s14, %s3498_s14   ;;  %s2104_s13 = sphi %s2163_s13, %s3497_s13   ;;  %s2100_s12 = sphi %s2161_s12, %s3496_s12  }
   0xd   : > { %3268 = sst [smem:[#allocation17_spill]] %s2104_s13  ;;  %s1731_s17 = sadd.s32 4294967294, %s2112_s15  }
   0xe   : > { %3269 = sst [smem:[#allocation18_spill]] %s2108_s14  ;;  %s2186_s18 = sadd.s32 1, %s2112_s15  }
   0xf   : > { %3270 = sst [smem:[#allocation19_spill]] %s2112_s15  ;;  %s70_s19 = sadd.s32 1, %s2108_s14 }
  0x10   : > { %3271 = sst [smem:[#allocation20_spill]] %s2182_s16  ;;  %s67_s20 = ssub.s32 %s2112_s15, %s2186_s18 }
  0x11   : > { %3272 = sst [smem:[#allocation21_spill]] %s2186_s18  ;;  %p77_p0 = scmp.ne.s32.totalorder %s2108_s14, %s2104_s13 }
  0x12   : > { %p68_p1 = scmp.eq.s32.totalorder %s67_s20, 0  ;;  %p78_p2 = scmp.eq.s32.totalorder %s2112_s15, 0 }
  0x13   : > { %p83_p3 = scmp.ne.s32.totalorder %s2104_s13, %s2100_s12  ;;  %p3232_p4 = scmp.eq.s32.totalorder %s2182_s16, 0 }
  0x14   : > { %s2198_s21 = scalar_select %p68_p1, %s2108_s14, %s70_s19  }
  0x15   : > { %p2200_p5 = por %p78_p2, %p77_p0  ;;  %p2206_p6 = por %p3232_p4, %p83_p3 }
  0x16   : > { %3273 = sst [smem:[#allocation22_spill]] %s2198_s21  ;;  %p107_p7 = scmp.eq.s32.totalorder %s2182_s16, 1 }
  0x17   : > { %s3275_s23 = scalar_select %p2206_p6, 1, 0 }
  0x18   : > { %p113_p8 = scmp.eq.s32.totalorder %s1731_s17, 1  ;;  %p1732_p9 = scmp.ge.s32.totalorder %s2112_s15, 1 }
  0x19   : > { %p120_p10 = scmp.lt.s32.totalorder %s2112_s15, 3  ;;  %p2213_p11 = por %p107_p7, %p77_p0 }
  0x1a   : > { %p2217_p12 = por %p113_p8, %p83_p3  ;;  %p1892_p4 = scmp.lt.s32.totalorder %s2112_s15, 2 }
  0x1b   : > { %s3276_s24 = scalar_select %p2213_p11, 1, 0 }
  0x1c   : > { %s3278_s25 = scalar_select %p2217_p12, 1, 0 }
  0x1d   : > { %3277 = sst [smem:[#allocation23_spill]] %s3276_s24  ;;  %p2221_p13 = pnand %p1732_p9, %p120_p10 }
  0x1e   : > { %3279 = sst [smem:[#allocation24_spill]] %s3278_s25  ;;  %s3281_s1 = sld [smem:[#allocation117_spill]] }
  0x1f   : > { %p1875_p2 = pneg %p2221_p13  ;;  %p3282_p0 = scmp.eq.s32.totalorder %s2182_s16, 0 }
  0x20   : > { %p2240_p3 = pnand %p1892_p4, %p2200_p5  ;;  %s153_s5 = sand.u32 1, %s2108_s14  }
  0x21   : > { %p2234_p7 = pnand %p1875_p2, %p3282_p0  ;;  %s3285_s0 = sld [smem:[#allocation116_spill]] }
  0x23   : > { %p1978_p9 = pneg %p2234_p7 }
  0x24   : > { %s142_s29 = sshll.u32 %s3281_s1, 4  ;;  %s143_s29 = int_to_ptr.vmem [resolvable:$true] %s142_s29 }
  0x27   : > { %s1976_s8 = scalar_lea.hbm %s3285_s0, 16 }
  0x28   : > { %p1977_p8 = scmp.ne.s32.totalorder %s3285_s0, %s1976_s8  ;;  %p1983_p4 = scmp.lt.u32.totalorder %s1976_s8, %s3285_s0 }
  0x2a   : > { %p1979_p10 = pnand %p1978_p9, %p1977_p8 }
  0x2c   : > { %p1980_p2 = pneg %p1979_p10 }
  0x2e   : > { %p1985_p5 = pnand %p1983_p4, %p1980_p2 }
  0x30   : > { %1988 = shalt.err (!%p1985_p5)
}
  0x31   : > { %s2118_s19 = smov [#allocation4]   ;;  %s1989_s27 = scalar_lea.vmem %s143_s29, 16 }
  0x32   : > { %1878 = dma.hbm_to_smem (!%p2234_p7), %s3285_s0, 16, %s2118_s19, [#allocation7]  }
  0x33   : > { %p1990_p0 = scmp.ne.s32.totalorder %s143_s29, %s1989_s27  ;;  %p1997_p11 = scmp.lt.s32.totalorder %s143_s29, %s143_s29 }
  0x34   : > { %p1998_p8 = scmp.lt.s32.totalorder %s1989_s27, %s1989_s27 }
  0x35   : > { %p1992_p1 = pnand %p1990_p0, %p1978_p9 }
  0x36   : > { %p1999_p10 = por %p1998_p8, %p1997_p11 }
  0x37   : > { %p1993_p12 = pneg %p1992_p1 }
  0x39   : > { %p2000_p6 = pnand %p1999_p10, %p1993_p12 }
  0x3b   : > { %2003 = shalt.err (!%p2000_p6)
}
  0x3c   : > { %s2119_s28 = smov [#allocation9]   ;;  %s1736_s6 = sshll.u32 %s153_s5, 7 }
  0x3d   : > { %1881 = dma.vmem_to_smem (!%p2234_p7), %s143_s29, 16, %s2119_s28, [#allocation8]  }
  0x3e   : > { %s1858_s7 = sshll.u32 %s2112_s15, 11  ;;  %s3286_s2 = sld [smem:[#allocation118_spill]] }
  0x3f   : > { %s157_s11 = scalar_lea.vmem [#allocation10], %s1736_s6  ;;  %s2271_s30 = scalar_lea.sflag [#allocation5], %s153_s5 }
  0x40   : > { %s165_s17 = sshll.u32 %s157_s11, 4  ;;  %p2006_p11 = pneg %p2240_p3  ;;  %s2269_s17 = int_to_ptr.vmem [resolvable:$true] %s165_s17 }
  0x44   : > { %s2267_s10 = scalar_lea.hbm %s3286_s2, %s1858_s7  ;;  %s2009_s22 = scalar_lea.hbm %s3286_s2, 4096 }
  0x45   : > { %s2004_s19 = scalar_lea.hbm %s2267_s10, 2048  ;;  %p2010_p7 = scmp.lt.u32.totalorder %s2267_s10, %s3286_s2 }
  0x46   : > { %p2005_p6 = scmp.ne.s32.totalorder %s2267_s10, %s2004_s19  ;;  %p2011_p9 = scmp.lt.u32.totalorder %s2009_s22, %s2004_s19 }
  0x47   : > { %p2013_p4 = scmp.lt.u32.totalorder %s2004_s19, %s2267_s10 }
  0x48   : > { %p2007_p12 = pnand %p2006_p11, %p2005_p6  ;;  %p2012_p2 = por %p2011_p9, %p2010_p7 }
  0x4a   : > { %p2008_p1 = pneg %p2007_p12  ;;  %p2014_p5 = por %p2013_p4, %p2012_p2 }
  0x4c   : > { %p2015_p0 = pnand %p2014_p5, %p2008_p1 }
  0x4e   : > { %2018 = shalt.err (!%p2015_p0)
}
  0x4f   : > { %s2019_s5 = scalar_lea.vmem %s2269_s17, 2048  ;;  %s2120_s6 = smov [#allocation10]  }
  0x50   : > { %p2020_p8 = scmp.ne.s32.totalorder %s2269_s17, %s2019_s5  ;;  %s2024_s7 = sshll.u32 %s2120_s6, 4  ;;  %s2025_s7 = int_to_ptr.vmem [resolvable:$false] %s2024_s7 }
  0x51   : > { %s2026_s8 = scalar_lea.vmem %s2025_s7, 4096  ;;  %p2027_p12 = scmp.lt.s32.totalorder %s2269_s17, %s2025_s7 }
  0x52   : > { %p2022_p10 = pnand %p2020_p8, %p2006_p11  ;;  %p2028_p7 = scmp.lt.s32.totalorder %s2026_s8, %s2019_s5 }
  0x54   : > { %p2023_p6 = pneg %p2022_p10  ;;  %p2029_p9 = por %p2028_p7, %p2027_p12 }
  0x56   : > { %p2030_p2 = pnand %p2029_p9, %p2023_p6 }
  0x58   : > { %2033 = shalt.err (!%p2030_p2)
}
  0x59   : > { %s2121_s9 = smov 256   ;;  %s2122_s11 = smov 16  }
  0x5a   : > { %1885 = dma.hbm_to_vmem [thread:$0]  (!%p2240_p3), %s2267_s10, 2048, %s2269_s17, %s2271_s30, %s2121_s9, %s2121_s9, %s2122_s11  }
  0x5b   : > { %177 = sbr.rel (%p2221_p13) target bundleno = 722 (0x2d2), region = 32 }
  0x62   : > { %p3287_p11 = scmp.eq.s32.totalorder %s2182_s16, 0 }
  0x64   : > { %2083 = dma.done.wait (%p3287_p11), [#allocation7], 16   ;;  %p3288_p1 = pmov %p3287_p11 }
  0x66   : > { %2085 = vsyncadd (%p3288_p1), [#allocation7], 4294967280  ;;  %p3289_p4 = pmov %p3288_p1 }
  0x67   : > { %p3290_p5 = pmov %p3288_p1 }
  0x68   : > { %2087 = dma.done.wait (%p3289_p4), [#allocation8], 16  }
  0x69   : > { %2089 = vsyncadd (%p3290_p5), [#allocation8], 4294967280  ;;  %s2310_s19 = sand.u32 1, %s2104_s13   ;;  %p3292_p13 = scmp.ne.s32.totalorder %s3275_s23, 0 }
  0x6a   : > { %s3235_s26 = sshll.u32 %s2310_s19, 7  ;;  %s188_s4 = scalar_lea.sflag [#allocation5], %s2310_s19 }
  0x6b   : > { %s2316_s10 = scalar_lea.vmem [#allocation10], %s3235_s26 }
  0x6c   : > { %3291 = sst [smem:[#allocation25_spill]] %s2316_s10 }
  0x6d   : > { %2091 = dma.done.wait (%p3292_p13), %s188_s4, 2048  }
  0x6e   : > { %2093 = vsyncadd (%p3292_p13), %s188_s4, 4294965248 }
  0x6f   : > { %196 = sfence }
  0x70   : > { %v3262_v0 = vlaneseq  ;;  %s2322_s17 = sld [smem:[#allocation4]]  ;;  %vm3261_vm0 = vcmask 7168   ;;  %vm403_vm1 = vcmask 1024   ;;  %s2324_s30 = sld [smem:[#allocation4 + $0x1]]  ;;  %v2123_v1 = vmov 0.0  }
  0x71   : > { %s2326_s29 = sld [smem:[#allocation4 + $0x2]]  ;;  %399 = vst [vmem:[#allocation2] sm:$0xff] %v2123_v1  ;;  %401 = vst.msk [vmem:[#allocation3] sm:$0xff] %vm3261_vm0, %v2123_v1  ;;  %s2331_s23 = sld [smem:[#allocation4 + $0x3]] }
  0x72   : > { %402 = vst.msk [vmem:[#allocation3 + $0x8] sm:$0xff] %vm3261_vm0, %v2123_v1  ;;  %v218_v2 = vand.u32 127, %v3262_v0  ;;  %s2333_s20 = sld [smem:[#allocation4 + $0x4]]  ;;  %s2335_s22 = sld [smem:[#allocation4 + $0x5]] }
  0x73   : > { %404 = vst.msk [vmem:[#allocation3 + $0x10] sm:$0x3] %vm403_vm1, %v2123_v1  ;;  %s2337_s27 = sld [smem:[#allocation4 + $0x6]]  ;;  %s2339_s28 = sld [smem:[#allocation4 + $0x7]] }
  0x74   : > { %v219_v3 = vadd.s32 128, %v218_v2  ;;  %v224_v4 = vand.u32 15, %v218_v2  ;;  %s2341_s5 = sld [smem:[#allocation4 + $0x8]]  ;;  %s2343_s6 = sld [smem:[#allocation4 + $0x9]] }
  0x75   : > { %s2345_s7 = sld [smem:[#allocation4 + $0xa]]  ;;  %s2353_s8 = sld [smem:[#allocation4 + $0xb]] }
  0x76   : > { %3293 = sst [smem:[#allocation26_spill]] %s2322_s17  ;;  %v231_v5 = vand.u32 15, %v219_v3  ;;  %v2347_v6 = vadd.s32 4294967293, %v224_v4  ;;  %v2349_v7 = vadd.s32 4294967294, %v224_v4  ;;  %v2351_v8 = vadd.s32 4294967295, %v224_v4  ;;  %s2361_s9 = sld [smem:[#allocation4 + $0xc]] }
  0x77   : > { %3294 = sst [smem:[#allocation27_spill]] %s2324_s30  ;;  %v2355_v9 = vadd.s32 1, %v224_v4  ;;  %v2357_v10 = vadd.s32 2, %v224_v4  ;;  %v2359_v11 = vadd.s32 3, %v224_v4  ;;  %s2369_s11 = sld [smem:[#allocation4 + $0xd]] }
  0x78   : > { %3295 = sst [smem:[#allocation28_spill]] %s2326_s29  ;;  %v2363_v12 = vadd.s32 4294967293, %v231_v5  ;;  %vm246_vm2 = vcmp.ge.s32.totalorder %v2347_v6, 0  ;;  %v2366_v13 = vadd.s32 4294967294, %v231_v5  ;;  %vm254_vm3 = vcmp.ge.s32.totalorder %v2349_v7, 0  ;;  %s2377_s4 = sld [smem:[#allocation4 + $0xe]] }
  0x79   : > { %3296 = sst [smem:[#allocation29_spill]] %s2331_s23  ;;  %v2371_v14 = vadd.s32 4294967295, %v231_v5  ;;  %vm262_vm4 = vcmp.ge.s32.totalorder %v2351_v8, 0  ;;  %v2374_v15 = vadd.s32 1, %v231_v5  ;;  %vm278_vm5 = vcmp.lt.s32.totalorder %v2355_v9, 16  ;;  %s2384_s26 = sld [smem:[#allocation4 + $0xf]] }
  0x7a   : > { %3297 = sst [smem:[#allocation30_spill]] %s2333_s20  ;;  %vm247_vm6 = vcmp.ge.s32.totalorder %v2363_v12, 0  ;;  %vm255_vm7 = vcmp.ge.s32.totalorder %v2366_v13, 0  ;;  %v2381_v16 = vadd.s32 2, %v231_v5  ;;  %vm286_vm8 = vcmp.lt.s32.totalorder %v2357_v10, 16  ;;  %s2391_s0 = sld [smem:[#allocation4 + $0x10]] }
  0x7b   : > { %3298 = sst [smem:[#allocation31_spill]] %s2335_s22  ;;  %vm263_vm9 = vcmp.ge.s32.totalorder %v2371_v14, 0  ;;  %vm279_vm10 = vcmp.lt.s32.totalorder %v2374_v15, 16  ;;  %v2388_v17 = vadd.s32 3, %v231_v5  ;;  %s2394_s1 = sld [smem:[#allocation4 + $0x11]] }
  0x7c   : > { %3299 = sst [smem:[#allocation32_spill]] %s2337_s27  ;;  %vm287_vm12 = vcmp.lt.s32.totalorder %v2381_v16, 16  ;;  %s2396_s2 = sld [smem:[#allocation4 + $0x12]] }
  0x7d   : > { %3300 = sst [smem:[#allocation33_spill]] %s2341_s5  ;;  %s2399_s21 = sld [smem:[#allocation4 + $0x13]] }
  0x7e   : > { %3301 = sst [smem:[#allocation34_spill]] %s2343_s6  ;;  %s2401_s14 = sld [smem:[#allocation4 + $0x14]] }
  0x7f   : > { %3302 = sst [smem:[#allocation35_spill]] %s2345_s7  ;;  %s2403_s13 = sld [smem:[#allocation4 + $0x15]] }
  0x80   : > { %3303 = sst [smem:[#allocation36_spill]] %s2353_s8  ;;  %s2405_s18 = sld [smem:[#allocation4 + $0x16]] }
  0x81   : > { %3304 = sst [smem:[#allocation37_spill]] %s2361_s9  ;;  %s2407_s15 = sld [smem:[#allocation4 + $0x17]] }
  0x82   : > { %3305 = sst [smem:[#allocation38_spill]] %s2369_s11  ;;  %s2409_s25 = sld [smem:[#allocation4 + $0x18]] }
  0x83   : > { %3306 = sst [smem:[#allocation39_spill]] %s2377_s4  ;;  %s2411_s12 = sld [smem:[#allocation4 + $0x19]] }
  0x84   : > { %3307 = sst [smem:[#allocation40_spill]] %s2391_s0  ;;  %s2413_s3 = sld [smem:[#allocation4 + $0x1a]] }
  0x85   : > { %3308 = sst [smem:[#allocation41_spill]] %s2394_s1  ;;  %s2415_s24 = sld [smem:[#allocation4 + $0x1b]] }
  0x86   : > { %3309 = sst [smem:[#allocation42_spill]] %s2396_s2  ;;  %s2417_s16 = sld [smem:[#allocation4 + $0x1c]] }
  0x87   : > { %3310 = sst [smem:[#allocation43_spill]] %s2401_s14  ;;  %s2419_s22 = sld [smem:[#allocation4 + $0x1d]] }
  0x88   : > { %3311 = sst [smem:[#allocation44_spill]] %s2403_s13  ;;  %s2421_s27 = sld [smem:[#allocation4 + $0x1e]] }
  0x89   : > { %3312 = sst [smem:[#allocation45_spill]] %s2407_s15  ;;  %s2423_s20 = sld [smem:[#allocation4 + $0x1f]] }
  0x8a   : > { %3313 = sst [smem:[#allocation46_spill]] %s2409_s25  ;;  %s2425_s30 = sld [smem:[#allocation4 + $0x20]] }
  0x8b   : > { %3314 = sst [smem:[#allocation47_spill]] %s2411_s12  ;;  %s2427_s23 = sld [smem:[#allocation4 + $0x21]] }
  0x8c   : > { %3315 = sst [smem:[#allocation48_spill]] %s2413_s3  ;;  %s2429_s29 = sld [smem:[#allocation4 + $0x22]] }
  0x8d   : > { %3316 = sst [smem:[#allocation49_spill]] %s2415_s24  ;;  %s2431_s17 = sld [smem:[#allocation4 + $0x23]] }
  0x8e   : > { %3317 = sst [smem:[#allocation50_spill]] %s2417_s16  ;;  %s2433_s12 = sld [smem:[#allocation4 + $0x24]] }
  0x8f   : > { %3318 = sst [smem:[#allocation51_spill]] %s2421_s27  ;;  %s2435_s3 = sld [smem:[#allocation4 + $0x25]] }
  0x90   : > { %3319 = sst [smem:[#allocation52_spill]] %s2423_s20  ;;  %s2437_s24 = sld [smem:[#allocation4 + $0x26]] }
  0x91   : > { %3320 = sst [smem:[#allocation53_spill]] %s2425_s30  ;;  %s2439_s25 = sld [smem:[#allocation4 + $0x27]] }
  0x92   : > { %3321 = sst [smem:[#allocation54_spill]] %s2427_s23  ;;  %s2441_s16 = sld [smem:[#allocation4 + $0x28]] }
  0x93   : > { %3322 = sst [smem:[#allocation55_spill]] %s2429_s29  ;;  %s2443_s27 = sld [smem:[#allocation4 + $0x29]] }
  0x94   : > { %3323 = sst [smem:[#allocation56_spill]] %s2431_s17  ;;  %s2445_s20 = sld [smem:[#allocation4 + $0x2a]] }
  0x95   : > { %3324 = sst [smem:[#allocation57_spill]] %s2433_s12  ;;  %s2447_s30 = sld [smem:[#allocation4 + $0x2b]] }
  0x96   : > { %3325 = sst [smem:[#allocation58_spill]] %s2435_s3  ;;  %s2449_s23 = sld [smem:[#allocation4 + $0x2c]] }
  0x97   : > { %3326 = sst [smem:[#allocation59_spill]] %s2437_s24  ;;  %s2451_s29 = sld [smem:[#allocation4 + $0x2d]] }
  0x98   : > { %3327 = sst [smem:[#allocation60_spill]] %s2439_s25  ;;  %s2453_s17 = sld [smem:[#allocation4 + $0x2e]] }
  0x99   : > { %3328 = sst [smem:[#allocation61_spill]] %s2441_s16  ;;  %s2455_s12 = sld [smem:[#allocation4 + $0x2f]] }
  0x9a   : > { %3329 = sst [smem:[#allocation62_spill]] %s2443_s27  ;;  %s2457_s3 = sld [smem:[#allocation4 + $0x30]] }
  0x9b   : > { %3330 = sst [smem:[#allocation63_spill]] %s2445_s20  ;;  %s2459_s24 = sld [smem:[#allocation4 + $0x31]] }
  0x9c   : > { %3331 = sst [smem:[#allocation64_spill]] %s2447_s30  ;;  %s2461_s25 = sld [smem:[#allocation4 + $0x32]] }
  0x9d   : > { %3332 = sst [smem:[#allocation65_spill]] %s2449_s23  ;;  %s2463_s16 = sld [smem:[#allocation4 + $0x33]] }
  0x9e   : > { %3333 = sst [smem:[#allocation66_spill]] %s2451_s29  ;;  %s2465_s27 = sld [smem:[#allocation4 + $0x34]] }
  0x9f   : > { %3334 = sst [smem:[#allocation67_spill]] %s2453_s17  ;;  %s2467_s20 = sld [smem:[#allocation4 + $0x35]] }
  0xa0   : > { %3335 = sst [smem:[#allocation68_spill]] %s2455_s12  ;;  %s2469_s30 = sld [smem:[#allocation4 + $0x36]] }
  0xa1   : > { %3336 = sst [smem:[#allocation69_spill]] %s2457_s3  ;;  %s2471_s23 = sld [smem:[#allocation4 + $0x37]] }
  0xa2   : > { %3337 = sst [smem:[#allocation70_spill]] %s2459_s24  ;;  %s2473_s29 = sld [smem:[#allocation4 + $0x38]] }
  0xa3   : > { %3338 = sst [smem:[#allocation71_spill]] %s2461_s25  ;;  %s2475_s17 = sld [smem:[#allocation4 + $0x39]] }
  0xa4   : > { %3339 = sst [smem:[#allocation72_spill]] %s2463_s16  ;;  %s2477_s12 = sld [smem:[#allocation4 + $0x3a]] }
  0xa5   : > { %3340 = sst [smem:[#allocation73_spill]] %s2465_s27  ;;  %s2479_s3 = sld [smem:[#allocation4 + $0x3b]] }
  0xa6   : > { %3341 = sst [smem:[#allocation74_spill]] %s2467_s20  ;;  %s2481_s24 = sld [smem:[#allocation4 + $0x3c]] }
  0xa7   : > { %3342 = sst [smem:[#allocation75_spill]] %s2469_s30  ;;  %s2483_s25 = sld [smem:[#allocation4 + $0x3d]] }
  0xa8   : > { %3343 = sst [smem:[#allocation76_spill]] %s2471_s23  ;;  %s2485_s16 = sld [smem:[#allocation4 + $0x3e]] }
  0xa9   : > { %3344 = sst [smem:[#allocation77_spill]] %s2473_s29  ;;  %s2487_s27 = sld [smem:[#allocation4 + $0x3f]] }
  0xaa   : > { %3345 = sst [smem:[#allocation78_spill]] %s2475_s17  ;;  %s2489_s20 = sld [smem:[#allocation4 + $0x40]] }
  0xab   : > { %3346 = sst [smem:[#allocation79_spill]] %s2477_s12  ;;  %s2491_s30 = sld [smem:[#allocation4 + $0x41]] }
  0xac   : > { %3347 = sst [smem:[#allocation80_spill]] %s2479_s3  ;;  %s2493_s23 = sld [smem:[#allocation4 + $0x42]] }
  0xad   : > { %3348 = sst [smem:[#allocation81_spill]] %s2481_s24  ;;  %s2495_s29 = sld [smem:[#allocation4 + $0x43]] }
  0xae   : > { %3349 = sst [smem:[#allocation82_spill]] %s2483_s25  ;;  %s2497_s17 = sld [smem:[#allocation4 + $0x44]] }
  0xaf   : > { %3350 = sst [smem:[#allocation83_spill]] %s2485_s16  ;;  %s2499_s12 = sld [smem:[#allocation4 + $0x45]] }
  0xb0   : > { %3351 = sst [smem:[#allocation84_spill]] %s2487_s27  ;;  %s2501_s3 = sld [smem:[#allocation4 + $0x46]] }
  0xb1   : > { %3352 = sst [smem:[#allocation85_spill]] %s2489_s20  ;;  %s2503_s24 = sld [smem:[#allocation4 + $0x47]] }
  0xb2   : > { %3353 = sst [smem:[#allocation86_spill]] %s2491_s30  ;;  %s2505_s25 = sld [smem:[#allocation4 + $0x48]] }
  0xb3   : > { %3354 = sst [smem:[#allocation87_spill]] %s2493_s23  ;;  %s2507_s16 = sld [smem:[#allocation4 + $0x49]] }
  0xb4   : > { %3355 = sst [smem:[#allocation88_spill]] %s2495_s29  ;;  %s2509_s27 = sld [smem:[#allocation4 + $0x4a]] }
  0xb5   : > { %3356 = sst [smem:[#allocation89_spill]] %s2497_s17  ;;  %s2511_s20 = sld [smem:[#allocation4 + $0x4b]] }
  0xb6   : > { %3357 = sst [smem:[#allocation90_spill]] %s2499_s12  ;;  %s2513_s30 = sld [smem:[#allocation4 + $0x4c]] }
  0xb7   : > { %3358 = sst [smem:[#allocation91_spill]] %s2501_s3  ;;  %s2515_s23 = sld [smem:[#allocation4 + $0x4d]] }
  0xb8   : > { %3359 = sst [smem:[#allocation92_spill]] %s2503_s24  ;;  %s2517_s29 = sld [smem:[#allocation4 + $0x4e]] }
  0xb9   : > { %3360 = sst [smem:[#allocation93_spill]] %s2505_s25  ;;  %s2519_s17 = sld [smem:[#allocation4 + $0x4f]] }
  0xba   : > { %3361 = sst [smem:[#allocation94_spill]] %s2507_s16  ;;  %s2521_s12 = sld [smem:[#allocation4 + $0x50]] }
  0xbb   : > { %3362 = sst [smem:[#allocation95_spill]] %s2509_s27  ;;  %s2523_s3 = sld [smem:[#allocation4 + $0x51]] }
  0xbc   : > { %3363 = sst [smem:[#allocation96_spill]] %s2511_s20  ;;  %s2525_s24 = sld [smem:[#allocation4 + $0x52]] }
  0xbd   : > { %3364 = sst [smem:[#allocation97_spill]] %s2513_s30  ;;  %s2527_s25 = sld [smem:[#allocation4 + $0x53]] }
  0xbe   : > { %3365 = sst [smem:[#allocation98_spill]] %s2515_s23  ;;  %s2529_s16 = sld [smem:[#allocation4 + $0x54]] }
  0xbf   : > { %3366 = sst [smem:[#allocation99_spill]] %s2517_s29  ;;  %s2531_s27 = sld [smem:[#allocation4 + $0x55]] }
  0xc0   : > { %3367 = sst [smem:[#allocation100_spill]] %s2519_s17  ;;  %s2533_s30 = sld [smem:[#allocation4 + $0x56]] }
  0xc1   : > { %3368 = sst [smem:[#allocation101_spill]] %s2521_s12  ;;  %s2535_s20 = sld [smem:[#allocation4 + $0x57]] }
  0xc2   : > { %3369 = sst [smem:[#allocation102_spill]] %s2523_s3  ;;  %s2537_s23 = sld [smem:[#allocation4 + $0x58]] }
  0xc3   : > { %3370 = sst [smem:[#allocation103_spill]] %s2525_s24  ;;  %s2539_s17 = sld [smem:[#allocation4 + $0x59]] }
  0xc4   : > { %3371 = sst [smem:[#allocation104_spill]] %s2527_s25  ;;  %s2541_s12 = sld [smem:[#allocation4 + $0x5a]] }
  0xc5   : > { %3372 = sst [smem:[#allocation105_spill]] %s2529_s16  ;;  %s2543_s3 = sld [smem:[#allocation4 + $0x5b]] }
  0xc6   : > { %3373 = sst [smem:[#allocation106_spill]] %s2531_s27  ;;  %s2545_s24 = sld [smem:[#allocation4 + $0x5c]] }
  0xc7   : > { %3374 = sst [smem:[#allocation107_spill]] %s2533_s30  ;;  %s2547_s25 = sld [smem:[#allocation4 + $0x5d]] }
  0xc8   : > { %3375 = sst [smem:[#allocation108_spill]] %s2535_s20  ;;  %s2549_s16 = sld [smem:[#allocation4 + $0x5e]] }
  0xc9   : > { %3376 = sst [smem:[#allocation109_spill]] %s2537_s23  ;;  %s2551_s27 = sld [smem:[#allocation4 + $0x5f]] }
  0xca   : > { %3377 = sst [smem:[#allocation110_spill]] %s2539_s17  ;;  %s2553_s29 = sld [smem:[#allocation4 + $0x60]] }
  0xcb   : > { %3378 = sst [smem:[#allocation111_spill]] %s2541_s12  ;;  %s2555_s30 = sld [smem:[#allocation4 + $0x61]] }
  0xcc   : > { %3379 = sst [smem:[#allocation112_spill]] %s2543_s3  ;;  %s2559_s23 = sld [smem:[#allocation9 + $0x1]] }
  0xcd   : > { %3380 = sst [smem:[#allocation113_spill]] %s2545_s24  ;;  %s2557_s20 = sld [smem:[#allocation9]] }
  0xce   : > { %s2561_s17 = sld [smem:[#allocation9 + $0x2]]  ;;  %s3383_s12 = sshll.u32 %s2310_s19, 7 }
  0xcf   : > { %s2565_s3 = scalar_lea.vmem [#allocation11], %s3383_s12  ;;  %s2567_s24 = smov 0  }
  0xd1   : > { %3381 = sst [smem:[#allocation114_spill]] %s2555_s30 }
  0xd3   : > { %3382 = sst [smem:[#allocation115_spill]] %s2557_s20 }
  0xd4 LB: >> { %s3384_s10 = sld [smem:[#allocation25_spill]]  ;;  %s3248_s30 = sshll.u32 %s2116_s24, 5  ;;  %v2124_v42 = vmov 1966171168   ;;  %v3385_v0 = vlaneseq  ;;  %v567_v5 = vstv %s2339_s28  ;;  %vm3451_vm0 = vcmask 7168   ;;  %s2116_s24 = sphi %s2567_s24, %s410_s24  }
  0xd5   : >> { %v505_v43 = vunpack.c.l.s4 %v2124_v42  ;;  %s3386_s5 = sld [smem:[#allocation33_spill]]  ;;  %s3387_s6 = sld [smem:[#allocation34_spill]]  ;;  %vm573_vm15 = vcmask 916480   ;;  %vm637_vm1 = vcmask 785408   ;;  %vm832_vm13 = vcmask 392192  }
  0xd6   : >> { %v2583_v53 = vshrl.u32 %v3385_v0, 7  ;;  %s3388_s8 = sld [smem:[#allocation36_spill]]  ;;  %vm521_vm14 = vcmp.lt.s32.totalorder %v3385_v0, 256  ;;  %s3389_s7 = sld [smem:[#allocation35_spill]]  ;;  %vm896_vm11 = vcmask 261120  }
  0xd7   : >> { %v506_v52 = vunpack.c.0.s8 %v505_v43  ;;  %s3390_s11 = sld [smem:[#allocation38_spill]]  ;;  %s3391_s9 = sld [smem:[#allocation37_spill]] }
  0xd8   : >> { %s3249_s12 = smov 112   ;;  %s3392_s4 = sld [smem:[#allocation39_spill]] }
  0xd9   : >> { %v509_v60 = vsub.s32 %v506_v52, %v2583_v53  ;;  %s3393_s1 = sld [smem:[#allocation41_spill]]  ;;  %s3394_s0 = sld [smem:[#allocation40_spill]]  ;;  %v772_v52 = vstv %s2419_s22 }
  0xda   : >> { %s2576_s20 = scalar_lea.vmem %s3384_s10, %s3248_s30  ;;  %s3395_s2 = sld [smem:[#allocation42_spill]] }
  0xdb   : >> { %v414_v18 = vld [vmem:[%s2576_s20] sm:$0xff]  ;;  %v415_v19 = vld [vmem:[%s2576_s20 + $0x8] sm:$0xff]  ;;  %v416_v20 = vld [vmem:[%s2576_s20 + $0x10] sm:$0xff]  ;;  %v577_v4 = vstv %s3386_s5  ;;  %s3396_s13 = sld [smem:[#allocation44_spill]]  ;;  %s3251_s30 = smov 96  }
  0xdc   : >> { %v427_v21 = vmax.f32 %v414_v18, %v415_v19  ;;  %v418_v22 = vadd.f32 %v415_v19, %v414_v18  ;;  %v417_v23 = vld [vmem:[%s2576_s20 + $0x18] sm:$0xff]  ;;  %v433_v24 = vadd.f32 %v416_v20, %v414_v18  ;;  %v450_v25 = vmax.f32 %v414_v18, %v416_v20  ;;  %s3397_s14 = sld [smem:[#allocation43_spill]]  ;;  %s3398_s15 = sld [smem:[#allocation45_spill]] }
  0xdd   : >> { %v440_v26 = vadd.f32 %v417_v23, %v415_v19  ;;  %v457_v27 = vmax.f32 %v415_v19, %v417_v23  ;;  %v430_v28 = vmax.f32 %v416_v20, %v417_v23  ;;  %v421_v31 = vadd.f32 %v417_v23, %v416_v20  ;;  %s3403_s5 = sld [smem:[#allocation57_spill]]  ;;  %s3407_s10 = sld [smem:[#allocation63_spill]] }
  0xde   : >> { %428 = vmax.xlane.f32.xlu1 %v427_v21  ;;  %419 = vadd.xlane.f32.xlu0 %v418_v22  ;;  %v434_v29 = vrot.slane %v433_v24, 4  ;;  %v451_v30 = vrot.slane %v450_v25, 4  ;;  %v586_v19 = vstv %s3387_s6  ;;  %v604_v20 = vstv %s3388_s8  ;;  %s3404_s6 = sld [smem:[#allocation58_spill]]  ;;  %s3405_s8 = sld [smem:[#allocation47_spill]] }
  0xdf   : >> { %v441_v32 = vrot.slane %v440_v26, 4  ;;  %v458_v33 = vrot.slane %v457_v27, 4 }
  0xe0   : >> { %v435_v34 = vadd.f32 %v434_v29, %v433_v24  ;;  %v452_v35 = vmax.f32 %v450_v25, %v451_v30  ;;  %v595_v25 = vstv %s3389_s7  ;;  %v613_v29 = vstv %s3391_s9  ;;  %s3253_s7 = smov 64   ;;  %s3255_s9 = smov 48  }
  0xe1   : >> { %v442_v36 = vadd.f32 %v441_v32, %v440_v26  ;;  %v459_v37 = vmax.f32 %v457_v27, %v458_v33  ;;  %v622_v26 = vstv %s3390_s11  ;;  %v641_v30 = vstv %s2384_s26  ;;  %s3431_s11 = sld [smem:[#allocation68_spill]] }
  0xe2   : >> { %v436_v38 = vrot.slane %v435_v34, 2  ;;  %v453_v39 = vrot.slane %v452_v35, 2  ;;  %431 = vmax.xlane.f32.xlu1 %v430_v28  ;;  %422 = vadd.xlane.f32.xlu0 %v421_v31  ;;  %v631_v33 = vstv %s3392_s4  ;;  %v696_v43 = vstv %s3396_s13  ;;  %s3402_s4 = sld [smem:[#allocation46_spill]]  ;;  %s3434_s13 = sld [smem:[#allocation91_spill]] }
  0xe3   : >> { %v443_v40 = vrot.slane %v442_v36, 2  ;;  %v460_v41 = vrot.slane %v459_v37, 2 }
  0xe4   : >> { %v437_v44 = vadd.f32 %v436_v38, %v435_v34  ;;  %v454_v45 = vmax.f32 %v452_v35, %v453_v39  ;;  %v659_v34 = vstv %s3393_s1  ;;  %v677_v38 = vstv %s2399_s21  ;;  %s3259_s1 = smov 80  }
  0xe5   : >> { %v444_v46 = vadd.f32 %v443_v40, %v442_v36  ;;  %v461_v47 = vmax.f32 %v459_v37, %v460_v41  ;;  %v650_v37 = vstv %s3394_s0  ;;  %v668_v41 = vstv %s3395_s2  ;;  %s3400_s0 = sld [smem:[#allocation56_spill]]  ;;  %s3401_s2 = sld [smem:[#allocation51_spill]] }
  0xe6   : >> { %v438_v48 = vrot.slane %v437_v44, 1  ;;  %v455_v49 = vrot.slane %v454_v45, 1 }
  0xe7   : >> { %v445_v50 = vrot.slane %v444_v46, 1  ;;  %v462_v51 = vrot.slane %v461_v47, 1 }
  0xe8   : >> { %v439_v54 = vadd.f32 %v438_v48, %v437_v44  ;;  %v456_v55 = vmax.f32 %v454_v45, %v455_v49 }
  0xe9   : >> { %v446_v56 = vadd.f32 %v445_v50, %v444_v46  ;;  %v463_v57 = vmax.f32 %v461_v47, %v462_v51  ;;  %v686_v46 = vstv %s3397_s14  ;;  %v715_v47 = vstv %s3398_s15  ;;  %s3443_s14 = sld [smem:[#allocation87_spill]]  ;;  %s3462_s15 = sld [smem:[#allocation30_spill]] }
  0xea   : >> { %v448_v58 = vmul.f32 0.0625, %v439_v54  ;;  %v706_v51 = vstv %s2405_s18 }
  0xeb   : >> { %v449_v59 = vmul.f32 0.0625, %v446_v56  ;;  %v527_v61 = vcombine.low %v456_v55, %v463_v57  ;;  %v826_v57 = vstv %s3400_s0  ;;  %s3408_s0 = sld [smem:[#allocation48_spill]] }
  0xed   : >> { %v503_v62 = vcombine.low %v448_v58, %v449_v59  ;;  %v534_v63 = vrot.slane %v527_v61, %v509_v60  ;;  %v724_v61 = vstv %s3402_s4  ;;  %s3410_s4 = sld [smem:[#allocation65_spill]] }
  0xef   : >> { %v510_v1 = vrot.slane %v503_v62, %v509_v60  ;;  %v541_v2 = vrot.slane %v534_v63, %v509_v60 }
  0xf1   : >> { %v517_v3 = vrot.slane %v510_v1, %v509_v60  ;;  %544 = vst.msk [vmem:[#allocation2 + $0x3] ss:$2 sm:$0x3] %vm521_vm14, %v541_v2  ;;  %v781_v60 = vstv %s3401_s2  ;;  %v836_v1 = vstv %s3403_s5  ;;  %v845_v2 = vstv %s3404_s6  ;;  %s3409_s2 = sld [smem:[#allocation52_spill]]  ;;  %s3412_s5 = sld [smem:[#allocation49_spill]] }
  0xf2   : >> { %s3257_s6 = smov 32  }
  0xf3   : >> { %524 = vst.msk [vmem:[#allocation2 + $0x2] ss:$2 sm:$0x3] %vm521_vm14, %v517_v3  ;;  %vm702_vm14 = vcmask 654336  }
  0xfa   : >> { %v2589_v18 = vld [vmem:[#allocation2] ss:$2 sm:$0x7] }
  0xfb   : >> { %v578_v21 = vmul.f32 %v577_v4, %v2589_v18  ;;  %v568_v22 = vmul.f32 %v567_v5, %v2589_v18  ;;  %v587_v23 = vmul.f32 %v586_v19, %v2589_v18  ;;  %v605_v24 = vmul.f32 %v604_v20, %v2589_v18  ;;  %v2624_v42 = vld [vmem:[#allocation2] ss:$2 sm:$0xf] }
  0xfc   : >> { %v596_v27 = vmul.f32 %v595_v25, %v2589_v18  ;;  %v623_v28 = vmul.f32 %v622_v26, %v2589_v18  ;;  %v614_v31 = vmul.f32 %v613_v29, %v2589_v18  ;;  %v642_v32 = vmul.f32 %v641_v30, %v2589_v18  ;;  %v2637_v50 = vld [vmem:[#allocation2 + $0x2] ss:$2 sm:$0x7] }
  0xfd   : >> { %580 = vrot.lane.b32.xlu1 %v578_v21, %s3249_s12  ;;  %570 = vrot.lane.b32.xlu0 %v568_v22, %s3249_s12  ;;  %v632_v35 = vmul.f32 %v631_v33, %v2589_v18  ;;  %v660_v36 = vmul.f32 %v659_v34, %v2589_v18  ;;  %v651_v39 = vmul.f32 %v650_v37, %v2589_v18  ;;  %v733_v5 = vstv %s3405_s8  ;;  %s3416_s8 = sld [smem:[#allocation78_spill]] }
  0xfe   : >> { %v678_v40 = vmul.f32 %v677_v38, %v2589_v18  ;;  %v669_v44 = vmul.f32 %v668_v41, %v2589_v18  ;;  %v697_v45 = vmul.f32 %v696_v43, %v2624_v42  ;;  %v687_v48 = vmul.f32 %v686_v46, %v2589_v18  ;;  %v2693_v38 = vld [vmem:[#allocation2 + $0x1] ss:$2 sm:$0x7] }
  0xff   : >> { %v716_v49 = vmul.f32 %v715_v47, %v2624_v42  ;;  %v707_v54 = vmul.f32 %v706_v51, %v2624_v42  ;;  %v773_v55 = vmul.f32 %v772_v52, %v2637_v50  ;;  %v827_v59 = vmul.f32 %v826_v57, %v2637_v50 }
 0x100   : >> { %v782_v62 = vmul.f32 %v781_v60, %v2637_v50  ;;  %v725_v63 = vmul.f32 %v724_v61, %v2624_v42  ;;  %v837_v3 = vmul.f32 %v836_v1, %v2637_v50  ;;  %v846_v4 = vmul.f32 %v845_v2, %v2637_v50 }
 0x101   : >> { %589 = vrot.lane.b32.xlu1 %v587_v23, %s3249_s12  ;;  %607 = vrot.lane.b32.xlu0 %v605_v24, %s3249_s12  ;;  %v734_v20 = vmul.f32 %v733_v5, %v2624_v42  ;;  %v890_v22 = vstv %s3407_s10  ;;  %v742_v23 = vstv %s3408_s0  ;;  %s3415_s10 = sld [smem:[#allocation54_spill]]  ;;  %s3417_s0 = smov 64  }
 0x102   : >> { %v891_v24 = vmul.f32 %v890_v22, %v2637_v50  ;;  %v743_v25 = vmul.f32 %v742_v23, %v2624_v42  ;;  %v790_v26 = vstv %s3409_s2  ;;  %s3419_s2 = sld [smem:[#allocation55_spill]]  ;;  %v936_v2 = vstv %s3431_s11  ;;  %s3441_s11 = sld [smem:[#allocation98_spill]] }
 0x103   : >> { %v937_v5 = vmul.f32 %v936_v2, %v2637_v50 }
 0x105   : >> { %598 = vrot.lane.b32.xlu1 %v596_v27, %s3249_s12  ;;  %625 = vrot.lane.b32.xlu0 %v623_v28, %s3249_s12  ;;  %v909_v27 = vstv %s3410_s4  ;;  %v791_v28 = vmul.f32 %v790_v26, %v2637_v50  ;;  %s3420_s4 = sld [smem:[#allocation66_spill]] }
 0x106   : >> { %v910_v29 = vmul.f32 %v909_v27, %v2637_v50 }
 0x109   : >> { %616 = vrot.lane.b32.xlu1 %v614_v31, %s3249_s12  ;;  %644 = vrot.lane.b32.xlu0 %v642_v32, %s3251_s30  ;;  %s3399_s12 = sld [smem:[#allocation50_spill]]  ;;  %v751_v31 = vstv %s3412_s5  ;;  %s3422_s5 = smov 48  }
 0x10a   : >> { %v752_v33 = vmul.f32 %v751_v31, %v2624_v42 }
 0x10b   : >> { %v918_v47 = vstv %s3420_s4  ;;  %s3432_s4 = sld [smem:[#allocation92_spill]] }
 0x10d   : >> { %634 = vrot.lane.b32.xlu1 %v632_v35, %s3251_s30  ;;  %662 = vrot.lane.b32.xlu0 %v660_v36, %s3251_s30 }
 0x10f   : >> { %v762_v56 = vstv %s3399_s12  ;;  %s3411_s12 = sld [smem:[#allocation53_spill]] }
 0x110   : >> { %v763_v58 = vmul.f32 %v762_v56, %v2637_v50 }
 0x111   : >> { %653 = vrot.lane.b32.xlu1 %v651_v39, %s3251_s30  ;;  %680 = vrot.lane.b32.xlu0 %v678_v40, %s3251_s30  ;;  %v808_v39 = vstv %s3415_s10  ;;  %v986_v40 = vstv %s3416_s8  ;;  %s3427_s10 = sld [smem:[#allocation62_spill]]  ;;  %s3428_s8 = sld [smem:[#allocation85_spill]] }
 0x112   : >> { %v809_v41 = vmul.f32 %v808_v39, %v2637_v50  ;;  %v987_v42 = vmul.f32 %v986_v40, %v2693_v38 }
 0x115   : >> { %671 = vrot.lane.b32.xlu1 %v669_v44, %s3251_s30  ;;  %699 = vrot.lane.b32.xlu0 %v697_v45, %s3259_s1  ;;  %v799_v30 = vstv %s3411_s12  ;;  %s3421_s12 = sld [smem:[#allocation67_spill]]  ;;  %v817_v44 = vstv %s3419_s2  ;;  %s3430_s2 = smov 32  }
 0x116   : >> { %v800_v32 = vmul.f32 %v799_v30, %v2637_v50  ;;  %v818_v46 = vmul.f32 %v817_v44, %v2637_v50 }
 0x117   : >> { %v1049_v61 = vstv %s3428_s8  ;;  %s3439_s8 = sld [smem:[#allocation99_spill]] }
 0x119   : >> { %689 = vrot.lane.b32.xlu1 %v687_v48, %s3251_s30  ;;  %718 = vrot.lane.b32.xlu0 %v716_v49, %s3259_s1  ;;  %s3406_s30 = sld [smem:[#allocation64_spill]]  ;;  %v919_v49 = vmul.f32 %v918_v47, %v2637_v50 }
 0x11b   : >> { %v927_v48 = vstv %s3421_s12  ;;  %s3433_s12 = smov 96  }
 0x11c   : >> { %v928_v51 = vmul.f32 %v927_v48, %v2637_v50 }
 0x11d   : >> { %709 = vrot.lane.b32.xlu1 %v707_v54, %s3259_s1  ;;  %775 = vrot.lane.b32.xlu0 %v773_v55, %s3253_s7  ;;  %v1179_v30 = vstv %s3439_s8  ;;  %s3450_s8 = sld [smem:[#allocation95_spill]] }
 0x11f   : >> { %v900_v19 = vstv %s3406_s30  ;;  %s3414_s30 = sld [smem:[#allocation60_spill]] }
 0x120   : >> { %v901_v21 = vmul.f32 %v900_v19, %v2637_v50 }
 0x121   : >> { %765 = vrot.lane.b32.xlu1 %v763_v58, %s3253_s7  ;;  %829 = vrot.lane.b32.xlu0 %v827_v59, %s3255_s9  ;;  %v881_v58 = vstv %s3427_s10  ;;  %s3438_s10 = sld [smem:[#allocation81_spill]] }
 0x122   : >> { %v882_v60 = vmul.f32 %v881_v58, %v2637_v50 }
 0x125   : >> { %784 = vrot.lane.b32.xlu1 %v782_v62, %s3253_s7  ;;  %727 = vrot.lane.b32.xlu0 %v725_v63, %s3259_s1  ;;  %s3413_s7 = sld [smem:[#allocation59_spill]]  ;;  %v863_v35 = vstv %s3414_s30  ;;  %s3425_s30 = smov 112   ;;  %v1050_v63 = vmul.f32 %v1049_v61, %v2693_v38 }
 0x126   : >> { %v864_v37 = vmul.f32 %v863_v35, %v2637_v50 }
 0x129   : >> { %839 = vrot.lane.b32.xlu1 %v837_v3, %s3255_s9  ;;  %848 = vrot.lane.b32.xlu0 %v846_v4, %s3255_s9  ;;  %s3418_s9 = sld [smem:[#allocation77_spill]]  ;;  %v2732_v3 = vld [vmem:[#allocation2 + $0x1] ss:$2 sm:$0xf]  ;;  %v1114_v4 = vstv %s3432_s4  ;;  %s3442_s4 = sld [smem:[#allocation82_spill]] }
 0x12a   : >> { %v1115_v19 = vmul.f32 %v1114_v4, %v2732_v3 }
 0x12b   : >> { %v854_v34 = vstv %s3413_s7  ;;  %s3424_s7 = sld [smem:[#allocation84_spill]] }
 0x12c   : >> { %v855_v36 = vmul.f32 %v854_v34, %v2637_v50 }
 0x12d   : >> { %736 = vrot.lane.b32.xlu1 %v734_v20, %s3259_s1  ;;  %903 = vrot.lane.b32.xlu0 %v901_v21, %s3257_s6  ;;  %v1105_v20 = vstv %s3434_s13  ;;  %s3444_s13 = sld [smem:[#allocation100_spill]] }
 0x12e   : >> { %v1106_v22 = vmul.f32 %v1105_v20, %v2732_v3 }
 0x12f   : >> { %v977_v43 = vstv %s3418_s9  ;;  %s3429_s9 = sld [smem:[#allocation86_spill]] }
 0x130   : >> { %v978_v45 = vmul.f32 %v977_v43, %v2693_v38 }
 0x131   : >> { %893 = vrot.lane.b32.xlu1 %v891_v24, %s3257_s6  ;;  %745 = vrot.lane.b32.xlu0 %v743_v25, %s3259_s1  ;;  %v1040_v54 = vstv %s3424_s7  ;;  %s3436_s7 = sld [smem:[#allocation80_spill]] }
 0x132   : >> { %v1041_v56 = vmul.f32 %v1040_v54, %v2693_v38 }
 0x135   : >> { %793 = vrot.lane.b32.xlu1 %v791_v28, %s3417_s0  ;;  %912 = vrot.lane.b32.xlu0 %v910_v29, %s3257_s6  ;;  %s3423_s6 = sld [smem:[#allocation61_spill]]  ;;  %v1058_v62 = vstv %s3429_s9  ;;  %s3440_s9 = smov 80   ;;  %v2751_v28 = vld [vmem:[#allocation2 + $0x3] ss:$2 sm:$0x7]  ;;  %v1013_v29 = vstv %s3438_s10 }
 0x136   : >> { %v1059_v1 = vmul.f32 %v1058_v62, %v2693_v38  ;;  %v1180_v31 = vmul.f32 %v1179_v30, %v2751_v28  ;;  %s3448_s10 = sld [smem:[#allocation83_spill]] }
 0x137   : >> { %v1004_v24 = vstv %s3436_s7  ;;  %s3446_s7 = sld [smem:[#allocation106_spill]] }
 0x138   : >> { %v1005_v26 = vmul.f32 %v1004_v24, %v2693_v38 }
 0x139   : >> { %802 = vrot.lane.b32.xlu1 %v800_v32, %s3417_s0  ;;  %754 = vrot.lane.b32.xlu0 %v752_v33, %s3259_s1  ;;  %s3426_s1 = sld [smem:[#allocation79_spill]]  ;;  %v1170_v32 = vstv %s3441_s11  ;;  %v1022_v33 = vstv %s3442_s4  ;;  %s3452_s11 = sld [smem:[#allocation89_spill]] }
 0x13a   : >> { %v1171_v34 = vmul.f32 %v1170_v32, %v2751_v28  ;;  %v1023_v35 = vmul.f32 %v1022_v33, %v2693_v38  ;;  %s3453_s4 = sld [smem:[#allocation112_spill]] }
 0x13b   : >> { %v872_v52 = vstv %s3423_s6  ;;  %s3435_s6 = sld [smem:[#allocation69_spill]] }
 0x13c   : >> { %v873_v55 = vmul.f32 %v872_v52, %v2637_v50 }
 0x13d   : >> { %857 = vrot.lane.b32.xlu1 %v855_v36, %s3422_s5  ;;  %866 = vrot.lane.b32.xlu0 %v864_v37, %s3422_s5  ;;  %v1067_v36 = vstv %s3443_s14  ;;  %v1188_v37 = vstv %s3444_s13  ;;  %s3449_s14 = sld [smem:[#allocation94_spill]]  ;;  %s3454_s13 = sld [smem:[#allocation107_spill]] }
 0x13e   : >> { %v1068_v39 = vmul.f32 %v1067_v36, %v2693_v38  ;;  %v1189_v40 = vmul.f32 %v1188_v37, %v2751_v28 }
 0x13f   : >> { %v995_v57 = vstv %s3426_s1  ;;  %s3437_s1 = sld [smem:[#allocation93_spill]]  ;;  %v1085_v2 = vstv %s3452_s11  ;;  %s3463_s11 = sld [smem:[#allocation32_spill]] }
 0x140   : >> { %v996_v59 = vmul.f32 %v995_v57, %v2693_v38  ;;  %v1296_v4 = vstv %s3453_s4  ;;  %v1086_v20 = vmul.f32 %v1085_v2, %v2693_v38  ;;  %s3464_s4 = sld [smem:[#allocation31_spill]] }
 0x141   : >> { %811 = vrot.lane.b32.xlu1 %v809_v41, %s3417_s0  ;;  %989 = vrot.lane.b32.xlu0 %v987_v42, %s3425_s30  ;;  %v945_v21 = vstv %s3435_s6  ;;  %s3445_s6 = sld [smem:[#allocation88_spill]]  ;;  %v1242_v42 = vstv %s3446_s7  ;;  %s3456_s7 = sld [smem:[#allocation26_spill]] }
 0x142   : >> { %v946_v23 = vmul.f32 %v945_v21, %v2637_v50  ;;  %v1014_v50 = vmul.f32 %v1013_v29, %v2693_v38  ;;  %v1243_v47 = vmul.f32 %v1242_v42, %v2751_v28  ;;  %v1297_v21 = vmul.f32 %v1296_v4, %v2751_v28 }
 0x145   : >> { %980 = vrot.lane.b32.xlu1 %v978_v45, %s3425_s30  ;;  %820 = vrot.lane.b32.xlu0 %v818_v46, %s3417_s0  ;;  %v1123_v25 = vstv %s3437_s1  ;;  %s3447_s1 = sld [smem:[#allocation105_spill]] }
 0x146   : >> { %v1124_v27 = vmul.f32 %v1123_v25, %v2732_v3  ;;  %v561_v42 = vstv %s3464_s4  ;;  %s3478_s4 = sld [smem:[#allocation115_spill]] }
 0x147   : >> { %v1076_v41 = vstv %s3445_s6  ;;  %s3455_s6 = sld [smem:[#allocation101_spill]] }
 0x148   : >> { %v1077_v46 = vmul.f32 %v1076_v41, %v2693_v38  ;;  %v564_v41 = vstv %s3463_s11  ;;  %s3477_s11 = sld [smem:[#allocation72_spill]] }
 0x149   : >> { %921 = vrot.lane.b32.xlu1 %v919_v49, %s3430_s2  ;;  %930 = vrot.lane.b32.xlu0 %v928_v51, %s3430_s2  ;;  %v1031_v51 = vstv %s3448_s10  ;;  %s3458_s10 = sld [smem:[#allocation29_spill]] }
 0x14a   : >> { %v1032_v57 = vmul.f32 %v1031_v51, %v2693_v38  ;;  %v1314_v51 = vstv %s2547_s25 }
 0x14b   : >> { %v1233_v49 = vstv %s3447_s1  ;;  %s3457_s1 = sld [smem:[#allocation28_spill]] }
 0x14d   : >> { %875 = vrot.lane.b32.xlu1 %v873_v55, %s3422_s5  ;;  %1043 = vrot.lane.b32.xlu0 %v1041_v56, %s3433_s12  ;;  %v1234_v56 = vmul.f32 %v1233_v49, %v2751_v28 }
 0x151   : >> { %998 = vrot.lane.b32.xlu1 %v996_v59, %s3425_s30  ;;  %884 = vrot.lane.b32.xlu0 %v882_v60, %s3422_s5  ;;  %v1132_v59 = vstv %s3449_s14  ;;  %v1141_v60 = vstv %s3450_s8  ;;  %s3459_s14 = sld [smem:[#allocation113_spill]]  ;;  %s3460_s8 = sld [smem:[#allocation96_spill]] }
 0x155   : >> { %1052 = vrot.lane.b32.xlu1 %v1050_v63, %s3433_s12  ;;  %1061 = vrot.lane.b32.xlu0 %v1059_v1, %s3433_s12  ;;  %v1133_v63 = vmul.f32 %v1132_v59, %v2732_v3  ;;  %v1142_v1 = vmul.f32 %v1141_v60, %v2732_v3 }
 0x157   : >> { %v1305_v32 = vstv %s3459_s14  ;;  %v1150_v33 = vstv %s3460_s8  ;;  %s3471_s14 = sld [smem:[#allocation104_spill]]  ;;  %s3476_s8 = sld [smem:[#allocation71_spill]] }
 0x159   : >> { %939 = vrot.lane.b32.xlu1 %v937_v5, %s3430_s2  ;;  %1117 = vrot.lane.b32.xlu0 %v1115_v19, %s3440_s9 }
 0x15d   : >> { %1108 = vrot.lane.b32.xlu1 %v1106_v22, %s3440_s9  ;;  %948 = vrot.lane.b32.xlu0 %v946_v23, %s3430_s2  ;;  %v1251_v22 = vstv %s3454_s13  ;;  %v1197_v23 = vstv %s3455_s6  ;;  %s3465_s13 = sld [smem:[#allocation90_spill]]  ;;  %s3466_s6 = sld [smem:[#allocation102_spill]] }
 0x15e   : >> { %v1252_v29 = vmul.f32 %v1251_v22, %v2751_v28  ;;  %v1198_v30 = vmul.f32 %v1197_v23, %v2751_v28 }
 0x161   : >> { %1007 = vrot.lane.b32.xlu1 %v1005_v26, %s3425_s30  ;;  %1126 = vrot.lane.b32.xlu0 %v1124_v27, %s3440_s9  ;;  %v546_v26 = vstv %s3456_s7  ;;  %v552_v27 = vstv %s3457_s1  ;;  %s3468_s7 = sld [smem:[#allocation108_spill]]  ;;  %s3469_s1 = sld [smem:[#allocation109_spill]] }
 0x163   : >> { %v1206_v60 = vstv %s3466_s6  ;;  %s2132_s6 = smov 51  }
 0x165   : >> { %1016 = vrot.lane.b32.xlu1 %v1014_v50, %s3425_s30  ;;  %1182 = vrot.lane.b32.xlu0 %v1180_v31, %s3417_s0  ;;  %v555_v50 = vstv %s3458_s10  ;;  %s3470_s10 = sld [smem:[#allocation103_spill]] }
 0x169   : >> { %1173 = vrot.lane.b32.xlu1 %v1171_v34, %s3417_s0  ;;  %1025 = vrot.lane.b32.xlu0 %v1023_v35, %s3425_s30  ;;  %v558_v35 = vstv %s3462_s15  ;;  %s3467_s15 = sld [smem:[#allocation97_spill]] }
 0x16b   : >> { %v429_v43 = vpop.xlane.xlu1 %428  ;;  %v420_v44 = vpop.xlane.xlu0 %419 }
 0x16c   : >> { %v425_v45 = vmul.f32 0.00390625, %v420_v44  ;;  %v1306_v44 = vmul.f32 %v1305_v32, %v2751_v28 }
 0x16d   : >> { %1070 = vrot.lane.b32.xlu1 %v1068_v39, %s3433_s12  ;;  %1191 = vrot.lane.b32.xlu0 %v1189_v40, %s3417_s0  ;;  %v547_v39 = vmul.f32 %v546_v26, %v2589_v18  ;;  %v553_v40 = vmul.f32 %v552_v27, %v2589_v18 }
 0x16e   : >> { %v464_v48 = vadd.f32 %v429_v43, %v425_v45  ;;  %v556_v43 = vmul.f32 %v555_v50, %v2589_v18  ;;  %v1151_v45 = vmul.f32 %v1150_v33, %v2732_v3  ;;  %v1260_v33 = vstv %s3468_s7  ;;  %s3481_s7 = sld [smem:[#allocation75_spill]] }
 0x16f   : >> { %v432_v52 = vpop.xlane.xlu1 %431  ;;  %v423_v54 = vpop.xlane.xlu0 %422 }
 0x170   : >> { %466 = vst.msk [vmem:[#allocation3 + $0x1] sm:$0xff] %vm3451_vm0, %v464_v48  ;;  %v426_v55 = vmul.f32 0.00390625, %v423_v54  ;;  %v2834_v54 = vmul.f32 %v564_v41, %v2589_v18 }
 0x171   : >> { %1079 = vrot.lane.b32.xlu1 %v1077_v46, %s3433_s12  ;;  %1245 = vrot.lane.b32.xlu0 %v1243_v47, %s3422_s5  ;;  %v1094_v46 = vstv %s3465_s13  ;;  %s3479_s13 = sld [smem:[#allocation73_spill]] }
 0x172   : >> { %v465_v58 = vadd.f32 %v432_v52, %v426_v55  ;;  %v559_v52 = vmul.f32 %v558_v35, %v2589_v18  ;;  %v562_v55 = vmul.f32 %v561_v42, %v2589_v18  ;;  %v1095_v4 = vmul.f32 %v1094_v46, %v2693_v38 }
 0x173   : >> { %v2786_v61 = vpop.permute.xlu1 %580  ;;  %v2788_v62 = vpop.permute.xlu0 %570  ;;  %v1269_v42 = vstv %s3469_s1  ;;  %s2133_s1 = smov 50  }
 0x174   : >> { %467 = vst.msk [vmem:[#allocation3 + $0x9] sm:$0xff] %vm3451_vm0, %v465_v58  ;;  %v572_v58 = vrot.slane %v2788_v62, 1  ;;  %vm768_vm0 = vcmask 523264  }
 0x175   : >> { %1236 = vrot.lane.b32.xlu1 %v1234_v56, %s3422_s5  ;;  %1034 = vrot.lane.b32.xlu0 %v1032_v57, %s3425_s30  ;;  %s3461_s30 = sld [smem:[#allocation27_spill]] }
 0x177   : >> { %v590_v5 = vpop.permute.xlu1 %589  ;;  %v2797_v19 = vpop.permute.xlu0 %607 }
 0x178   : >> { %v591_v47 = vrot.slane %v590_v5, 1 }
 0x179   : >> { %1135 = vrot.lane.b32.xlu1 %v1133_v63, %s3440_s9  ;;  %1144 = vrot.lane.b32.xlu0 %v1142_v1, %s3440_s9  ;;  %v1159_v63 = vstv %s3467_s15  ;;  %v609_v1 = vrot.slane %v2797_v19, 1  ;;  %s3480_s15 = sld [smem:[#allocation74_spill]] }
 0x17a   : >> { %v1160_v50 = vmul.f32 %v1159_v63, %v2732_v3 }
 0x17b   : >> { %v599_v24 = vpop.permute.xlu1 %598  ;;  %v2805_v25 = vpop.permute.xlu0 %625  ;;  %v549_v34 = vstv %s3461_s30 }
 0x17c   : >> { %v600_v31 = vrot.slane %v599_v24, 1 }
 0x17d   : >> { %1088 = vrot.lane.b32.xlu1 %v1086_v20, %s3433_s12  ;;  %1299 = vrot.lane.b32.xlu0 %v1297_v21, %s3430_s2  ;;  %v1315_v20 = vmul.f32 %v1314_v51, %v2751_v28  ;;  %v592_v21 = vsel %vm573_vm15, %v590_v5, %v591_v47 }
 0x17e   : >> { %v601_v48 = vsel %vm573_vm15, %v599_v24, %v600_v31  ;;  %v574_v31 = vsel %vm573_vm15, %v2788_v62, %v572_v58  ;;  %v594_v35 = vadd.f32 %v592_v21, %v553_v40 }
 0x17f   : >> { %v617_v36 = vpop.permute.xlu1 %616  ;;  %v2818_v37 = vpop.permute.xlu0 %644  ;;  %v603_v2 = vadd.f32 %v601_v48, %v556_v43  ;;  %v627_v43 = vrot.slane %v2805_v25, 1  ;;  %v576_v40 = vadd.f32 %v574_v31, %v547_v39  ;;  %v1261_v48 = vmul.f32 %v1260_v33, %v2751_v28 }
 0x180   : >> { %v618_v49 = vrot.slane %v617_v36, 1  ;;  %v1215_v39 = vstv %s3470_s10  ;;  %v646_v63 = vrot.slane %v2818_v37, 1  ;;  %v1332_v31 = vstv %s2551_s27  ;;  %s3482_s10 = sld [smem:[#allocation76_spill]] }
 0x181   : >> { %1254 = vrot.lane.b32.xlu1 %v1252_v29, %s3422_s5  ;;  %1200 = vrot.lane.b32.xlu0 %v1198_v30, %s3417_s0  ;;  %v1207_v30 = vmul.f32 %v1206_v60, %v2751_v28  ;;  %v628_v60 = vsel %vm573_vm15, %v2805_v25, %v627_v43  ;;  %v1333_v43 = vmul.f32 %v1332_v31, %v2751_v28 }
 0x182   : >> { %v619_v22 = vsel %vm573_vm15, %v617_v36, %v618_v49  ;;  %v610_v36 = vsel %vm573_vm15, %v2797_v19, %v609_v1  ;;  %v582_v49 = vrot.slane %v2786_v61, 1 }
 0x183   : >> { %v635_v56 = vpop.permute.xlu1 %634  ;;  %v663_v57 = vpop.permute.xlu0 %662  ;;  %v621_v41 = vadd.f32 %v619_v22, %v562_v55 }
 0x184   : >> { %v664_v59 = vrot.slane %v663_v57, 1  ;;  %v636_v23 = vrot.slane %v635_v56, 1 }
 0x185   : >> { %1308 = vrot.lane.b32.xlu1 %v1306_v44, %s3430_s2  ;;  %1153 = vrot.lane.b32.xlu0 %v1151_v45, %s3440_s9 }
 0x186   : >> { %v665_v24 = vsel %vm637_vm1, %v663_v57, %v664_v59  ;;  %v638_v3 = vsel %vm637_vm1, %v635_v56, %v636_v23  ;;  %v1270_v56 = vmul.f32 %v1269_v42, %v2751_v28  ;;  %v612_v57 = vadd.f32 %v610_v36, %v559_v52 }
 0x187   : >> { %v2848_v26 = vadd.f32 %v665_v24, %v603_v2  ;;  %v654_v27 = vpop.permute.xlu1 %653  ;;  %v681_v29 = vpop.permute.xlu0 %680  ;;  %v640_v58 = vadd.f32 %v638_v3, %v576_v40  ;;  %v1224_v59 = vstv %s3471_s14  ;;  %v550_v52 = vmul.f32 %v549_v34, %v2589_v18  ;;  %s2134_s14 = smov 49  }
 0x188   : >> { %v655_v32 = vrot.slane %v654_v27, 1  ;;  %v682_v5 = vrot.slane %v681_v29, 1  ;;  %v583_v23 = vsel %vm573_vm15, %v2786_v61, %v582_v49  ;;  %v1225_v18 = vmul.f32 %v1224_v59, %v2751_v28 }
 0x189   : >> { %1097 = vrot.lane.b32.xlu1 %v1095_v4, %s3433_s12  ;;  %1317 = vrot.lane.b32.xlu0 %v1315_v20, %s3430_s2  ;;  %v1323_v34 = vstv %s2549_s16  ;;  %s3472_s12 = sld [smem:[#allocation110_spill]]  ;;  %v1341_v40 = vstv %s2553_s29 }
 0x18a   : >> { %v656_v44 = vsel %vm637_vm1, %v654_v27, %v655_v32  ;;  %v683_v62 = vsel %vm637_vm1, %v681_v29, %v682_v5  ;;  %v630_v27 = vadd.f32 %v628_v60, %v2834_v54  ;;  %v1216_v29 = vmul.f32 %v1215_v39, %v2751_v28 }
 0x18b   : >> { %v658_v45 = vadd.f32 %v656_v44, %v594_v35  ;;  %v2864_v46 = vadd.f32 %v683_v62, %v621_v41  ;;  %v672_v19 = vpop.permute.xlu1 %671  ;;  %v700_v47 = vpop.permute.xlu0 %699  ;;  %v585_v32 = vadd.f32 %v583_v23, %v550_v52 }
 0x18c   : >> { %v673_v51 = vrot.slane %v672_v19, 1  ;;  %v701_v55 = vrot.slane %v700_v47, 1 }
 0x18d   : >> { %1209 = vrot.lane.b32.xlu1 %v1207_v30, %s3417_s0  ;;  %1162 = vrot.lane.b32.xlu0 %v1160_v50, %s3440_s9  ;;  %v647_v30 = vsel %vm637_vm1, %v2818_v37, %v646_v63  ;;  %v1324_v37 = vmul.f32 %v1323_v34, %v2751_v28  ;;  %s3473_s9 = sld [smem:[#allocation111_spill]] }
 0x18e   : >> { %v674_v1 = vsel %vm637_vm1, %v672_v19, %v673_v51  ;;  %v703_v2 = vsel %vm702_vm14, %v700_v47, %v701_v55  ;;  %v649_v42 = vadd.f32 %v647_v30, %v585_v32 }
 0x18f   : >> { %v2881_v4 = vadd.f32 %v674_v1, %v612_v57  ;;  %v705_v20 = vadd.f32 %v703_v2, %v640_v58  ;;  %v690_v21 = vpop.permute.xlu1 %689  ;;  %v719_v22 = vpop.permute.xlu0 %718  ;;  %v1278_v62 = vstv %s3472_s12  ;;  %s2135_s12 = smov 47  }
 0x190   : >> { %v691_v25 = vrot.slane %v690_v21, 1  ;;  %v720_v24 = vrot.slane %v719_v22, 1  ;;  %v1279_v55 = vmul.f32 %v1278_v62, %v2751_v28 }
 0x191   : >> { %1263 = vrot.lane.b32.xlu1 %v1261_v48, %s3422_s5  ;;  %1272 = vrot.lane.b32.xlu0 %v1270_v56, %s3422_s5  ;;  %v1342_v56 = vmul.f32 %v1341_v40, %v2751_v28 }
 0x192   : >> { %v692_v50 = vsel %vm637_vm1, %v690_v21, %v691_v25  ;;  %v721_v61 = vsel %vm702_vm14, %v719_v22, %v720_v24 }
 0x193   : >> { %v2896_v54 = vadd.f32 %v692_v50, %v630_v27  ;;  %v723_v5 = vadd.f32 %v721_v61, %v658_v45  ;;  %v710_v33 = vpop.permute.xlu1 %709  ;;  %v776_v35 = vpop.permute.xlu0 %775  ;;  %v1287_v39 = vstv %s3473_s9  ;;  %s2137_s9 = smov 45  }
 0x194   : >> { %v711_v36 = vrot.slane %v710_v33, 1  ;;  %v777_v41 = vrot.slane %v776_v35, 7  ;;  %v1288_v21 = vmul.f32 %v1287_v39, %v2751_v28 }
 0x195   : >> { %1218 = vrot.lane.b32.xlu1 %v1216_v29, %s3417_s0  ;;  %1227 = vrot.lane.b32.xlu0 %v1225_v18, %s3417_s0  ;;  %s3474_s0 = sld [smem:[#allocation114_spill]] }
 0x196   : >> { %v712_v3 = vsel %vm702_vm14, %v710_v33, %v711_v36  ;;  %v778_v44 = vsel %vm768_vm0, %v777_v41, %v776_v35 }
 0x197   : >> { %v714_v45 = vadd.f32 %v712_v3, %v649_v42  ;;  %v766_v19 = vpop.permute.xlu1 %765  ;;  %v830_v47 = vpop.permute.xlu0 %829 }
 0x198   : >> { %v767_v48 = vrot.slane %v766_v19, 7  ;;  %v831_v49 = vrot.slane %v830_v47, 7 }
 0x199   : >> { %v780_v51 = vadd.f32 %v778_v44, %v714_v45  ;;  %1326 = vrot.lane.b32.xlu1 %v1324_v37, %s3430_s2  ;;  %1335 = vrot.lane.b32.xlu0 %v1333_v43, %s3430_s2 }
 0x19a   : >> { %v769_v57 = vsel %vm768_vm0, %v767_v48, %v766_v19  ;;  %v833_v58 = vsel %vm832_vm13, %v831_v49, %v830_v47 }
 0x19b   : >> { %v771_v59 = vadd.f32 %v769_v57, %v705_v20  ;;  %v785_v60 = vpop.permute.xlu1 %784  ;;  %v728_v63 = vpop.permute.xlu0 %727  ;;  %v1350_v25 = vstv %s3474_s0  ;;  %s3485_s0 = sshll.u32 %s2116_s24, 5  ;;  %s410_s24 = sadd.s32 1, %s2116_s24  }
 0x19c   : >> { %v786_v1 = vrot.slane %v785_v60, 7  ;;  %v729_v2 = vrot.slane %v728_v63, 1  ;;  %v1351_v30 = vmul.f32 %v1350_v25, %v2751_v28  ;;  %p407_p3 = scmp.ge.s32.totalorder %s410_s24, 4  }
 0x19d   : >> { %v835_v52 = vadd.f32 %v833_v58, %v771_v59  ;;  %1281 = vrot.lane.b32.xlu1 %v1279_v55, %s3422_s5  ;;  %1344 = vrot.lane.b32.xlu0 %v1342_v56, %s3430_s2  ;;  %v2131_v55 = vmov 0   ;;  %s2138_s16 = smov (%p407_p3), [#allocation11]  }
 0x19e   : >> { %v787_v22 = vsel %vm768_vm0, %v786_v1, %v785_v60  ;;  %v730_v23 = vsel %vm702_vm14, %v728_v63, %v729_v2  ;;  %1958 = vset.pattern.permute.xlu0 %v2131_v55  ;;  %1957 = vset.pattern.permute.xlu1 %v2131_v55  ;;  %s2038_s18 = sshll.u32 (%p407_p3), %s2138_s16, 4  ;;  %s2039_s18 = int_to_ptr.vmem [resolvable:$false] %s2038_s18 }
 0x19f   : >> { %v789_v24 = vadd.f32 %v787_v22, %v723_v5  ;;  %v732_v27 = vadd.f32 %v730_v23, %v2848_v26  ;;  %v840_v20 = vpop.permute.xlu1 %839  ;;  %v849_v29 = vpop.permute.xlu0 %848  ;;  %s2040_s21 = scalar_lea.vmem (%p407_p3), %s2039_s18, 4096 }
 0x1a0   : >> { %v841_v18 = vrot.slane %v840_v20, 7  ;;  %v850_v34 = vrot.slane %v849_v29, 7 }
 0x1a1   : >> { %1290 = vrot.lane.b32.xlu1 %v1288_v21, %s3422_s5 }
 0x1a2   : >> { %v842_v50 = vsel %vm832_vm13, %v841_v18, %v840_v20  ;;  %v851_v61 = vsel %vm832_vm13, %v850_v34, %v849_v29 }
 0x1a3   : >> { %v844_v31 = vadd.f32 %v842_v50, %v780_v51  ;;  %v853_v32 = vadd.f32 %v851_v61, %v789_v24  ;;  %v737_v33 = vpop.permute.xlu1 %736  ;;  %v904_v35 = vpop.permute.xlu0 %903 }
 0x1a4   : >> { %v738_v5 = vrot.slane %v737_v33, 1  ;;  %v905_v36 = vrot.slane %v904_v35, 7 }
 0x1a5   : >> { %1353 = vrot.lane.b32.xlu1 %v1351_v30, %s3430_s2  ;;  %s3475_s2 = sld [smem:[#allocation70_spill]] }
 0x1a6   : >> { %v739_v26 = vsel %vm702_vm14, %v737_v33, %v738_v5  ;;  %v906_v41 = vsel %vm896_vm11, %v905_v36, %v904_v35 }
 0x1a7   : >> { %v741_v42 = vadd.f32 %v739_v26, %v2881_v4  ;;  %v2928_v28 = vadd.f32 %v906_v41, %v844_v31  ;;  %v894_v37 = vpop.permute.xlu1 %893  ;;  %v746_v43 = vpop.permute.xlu0 %745 }
 0x1a8   : >> { %v895_v3 = vrot.slane %v894_v37, 7  ;;  %v747_v44 = vrot.slane %v746_v43, 1 }
 0x1aa   : >> { %v897_v62 = vsel %vm896_vm11, %v895_v3, %v894_v37  ;;  %v748_v40 = vsel %vm702_vm14, %v746_v43, %v747_v44 }
 0x1ab   : >> { %v2932_v45 = vadd.f32 %v897_v62, %v835_v52  ;;  %v750_v19 = vadd.f32 %v748_v40, %v2864_v46  ;;  %v794_v47 = vpop.permute.xlu1 %793  ;;  %v913_v48 = vpop.permute.xlu0 %912 }
 0x1ac   : >> { %v795_v49 = vrot.slane %v794_v47, 7  ;;  %v914_v51 = vrot.slane %v913_v48, 7 }
 0x1ae   : >> { %v796_v4 = vsel %vm768_vm0, %v795_v49, %v794_v47  ;;  %v915_v56 = vsel %vm896_vm11, %v914_v51, %v913_v48 }
 0x1af   : >> { %v798_v57 = vadd.f32 %v796_v4, %v732_v27  ;;  %v2937_v58 = vadd.f32 %v915_v56, %v853_v32  ;;  %v803_v39 = vpop.permute.xlu1 %802  ;;  %v755_v59 = vpop.permute.xlu0 %754 }
 0x1b0   : >> { %v804_v60 = vrot.slane %v803_v39, 7  ;;  %v756_v63 = vrot.slane %v755_v59, 1 }
 0x1b2   : >> { %v805_v46 = vsel %vm768_vm0, %v804_v60, %v803_v39  ;;  %v757_v1 = vsel %vm702_vm14, %v755_v59, %v756_v63 }
 0x1b3   : >> { %v807_v2 = vadd.f32 %v805_v46, %v741_v42  ;;  %v759_v52 = vadd.f32 %v757_v1, %v2896_v54  ;;  %v858_v21 = vpop.permute.xlu1 %857  ;;  %v867_v22 = vpop.permute.xlu0 %866 }
 0x1b4   : >> { %v859_v23 = vrot.slane %v858_v21, 7  ;;  %v868_v25 = vrot.slane %v867_v22, 7 }
 0x1b6   : >> { %v860_v24 = vsel %vm832_vm13, %v859_v23, %v858_v21  ;;  %v869_v27 = vsel %vm832_vm13, %v868_v25, %v867_v22 }
 0x1b7   : >> { %v862_v20 = vadd.f32 %v860_v24, %v798_v57  ;;  %v871_v29 = vadd.f32 %v869_v27, %v807_v2  ;;  %v812_v18 = vpop.permute.xlu1 %811  ;;  %v2944_v34 = vpop.permute.xlu0 %989 }
 0x1b8   : >> { %v813_v30 = vrot.slane %v812_v18, 7 }
 0x1ba   : >> { %v814_v50 = vsel %vm768_vm0, %v813_v30, %v812_v18 }
 0x1bb   : >> { %v816_v61 = vadd.f32 %v814_v50, %v750_v19  ;;  %v981_v31 = vpop.permute.xlu1 %980  ;;  %v821_v32 = vpop.permute.xlu0 %820  ;;  %v956_v50 = vstv %s3475_s2  ;;  %s1605_s2 = scalar_lea.vmem %s2565_s3, %s3485_s0 [#allocation11] }
 0x1bc   : >> { %v822_v54 = vrot.slane %v821_v32, 7 }
 0x1be   : >> { %v823_v33 = vsel %vm768_vm0, %v822_v54, %v821_v32  ;;  %v957_v32 = vmul.f32 %v956_v50, %v2693_v38  ;;  %v3004_v50 = vsub.s32 0, %v2583_v53 }
 0x1bf   : >> { %v825_v35 = vadd.f32 %v823_v33, %v759_v52  ;;  %v922_v5 = vpop.permute.xlu1 %921  ;;  %v931_v36 = vpop.permute.xlu0 %930 }
 0x1c0   : >> { %v923_v26 = vrot.slane %v922_v5, 7  ;;  %v932_v41 = vrot.slane %v931_v36, 7 }
 0x1c2   : >> { %v924_v42 = vsel %vm896_vm11, %v923_v26, %v922_v5  ;;  %v933_v37 = vsel %vm896_vm11, %v932_v41, %v931_v36  ;;  %v958_v26 = vadd.f32 %v957_v32, %v2932_v45  ;;  %v962_v45 = vstv %s3477_s11 }
 0x1c3   : >> { %v2950_v43 = vadd.f32 %v924_v42, %v862_v20  ;;  %v2952_v3 = vadd.f32 %v933_v37, %v871_v29  ;;  %v876_v44 = vpop.permute.xlu1 %875  ;;  %v1044_v62 = vpop.permute.xlu0 %1043  ;;  %v959_v37 = vstv %s3476_s8  ;;  %v963_v32 = vmul.f32 %v962_v45, %v2693_v38  ;;  %s3487_s8 = sld [smem:[#allocation23_spill]] (%p407_p3) }
 0x1c4   : >> { %v877_v40 = vrot.slane %v876_v44, 7 }
 0x1c6   : >> { %v878_v19 = vsel %vm832_vm13, %v877_v40, %v876_v44 }
 0x1c7   : >> { %v880_v47 = vadd.f32 %v878_v19, %v816_v61  ;;  %v2955_v48 = vpop.permute.xlu1 %998  ;;  %v885_v49 = vpop.permute.xlu0 %884  ;;  %v982_v61 = vrot.slane %v981_v31, 1 }
 0x1c8   : >> { %v886_v51 = vrot.slane %v885_v49, 7 }
 0x1c9   : >> { %v983_v5 = vsel %vm573_vm15, %v981_v31, %v982_v61  ;;  %p3489_p8 = scmp.ne.s32.totalorder (%p407_p3), %s3487_s8, 0 }
 0x1ca   : >> { %v887_v55 = vsel %vm832_vm13, %v886_v51, %v885_v49  ;;  %v985_v19 = vadd.f32 %v983_v5, %v958_v26 }
 0x1cb   : >> { %v889_v4 = vadd.f32 %v887_v55, %v825_v35  ;;  %v1053_v56 = vpop.permute.xlu1 %1052  ;;  %v2958_v57 = vpop.permute.xlu0 %1061  ;;  %v1045_v35 = vrot.slane %v1044_v62, 1  ;;  %v960_v55 = vmul.f32 %v959_v37, %v2693_v38 }
 0x1cc   : >> { %v1063_v26 = vrot.slane %v2958_v57, 1 }
 0x1cd   : >> { %v1046_v44 = vsel %vm637_vm1, %v1044_v62, %v1045_v35  ;;  %v1000_v62 = vrot.slane %v2955_v48, 1  ;;  %v961_v61 = vadd.f32 %v960_v55, %v2928_v28  ;;  %v3015_v28 = vsub.s32 1, %v2583_v53 }
 0x1ce   : >> { %v1048_v31 = vadd.f32 %v1046_v44, %v985_v19  ;;  %v964_v55 = vadd.f32 %v963_v32, %v2937_v58  ;;  %v477_v32 = vstv %s2559_s23 }
 0x1cf   : >> { %v940_v39 = vpop.permute.xlu1 %939  ;;  %v1118_v59 = vpop.permute.xlu0 %1117 }
 0x1d0   : >> { %v941_v60 = vrot.slane %v940_v39, 7 }
 0x1d2   : >> { %v942_v63 = vsel %vm896_vm11, %v941_v60, %v940_v39  ;;  %v1054_v60 = vrot.slane %v1053_v56, 1 }
 0x1d3   : >> { %v2961_v46 = vadd.f32 %v942_v63, %v880_v47  ;;  %v1109_v1 = vpop.permute.xlu1 %1108  ;;  %v949_v2 = vpop.permute.xlu0 %948  ;;  %v991_v47 = vrot.slane %v2944_v34, 1 }
 0x1d4   : >> { %v950_v52 = vrot.slane %v949_v2, 7  ;;  %v1110_v36 = vrot.slane %v1109_v1, 1 }
 0x1d6   : >> { %v951_v21 = vsel %vm896_vm11, %v950_v52, %v949_v2  ;;  %v1111_v49 = vsel %vm702_vm14, %v1109_v1, %v1110_v36  ;;  %v992_v52 = vsel %vm573_vm15, %v2944_v34, %v991_v47  ;;  %v1055_v36 = vsel %vm637_vm1, %v1053_v56, %v1054_v60 }
 0x1d7   : >> { %v2964_v22 = vadd.f32 %v951_v21, %v889_v4  ;;  %v2966_v23 = vpop.permute.xlu1 %1007  ;;  %v2968_v25 = vpop.permute.xlu0 %1126  ;;  %v1113_v2 = vadd.f32 %v1111_v49, %v1048_v31  ;;  %v1119_v21 = vrot.slane %v1118_v59, 1  ;;  %v994_v44 = vadd.f32 %v992_v52, %v961_v61  ;;  %v468_v52 = vld [vmem:[#allocation3] sm:$0xff] }
 0x1d8   : >> { %v1128_v47 = vrot.slane %v2968_v25, 1 }
 0x1d9   : >> { %v1120_v19 = vsel %vm702_vm14, %v1118_v59, %v1119_v21  ;;  %v1057_v31 = vadd.f32 %v1055_v36, %v994_v44  ;;  %v469_v36 = vld [vmem:[#allocation3 + $0x8] sm:$0xff] }
 0x1db   : >> { %v2970_v24 = vpop.permute.xlu1 %1016  ;;  %v1183_v27 = vpop.permute.xlu0 %1182 }
 0x1dc   : >> { %v1184_v34 = vrot.slane %v1183_v27, 7 }
 0x1de   : >> { %v1185_v59 = vsel %vm768_vm0, %v1184_v34, %v1183_v27 }
 0x1df   : >> { %v1174_v20 = vpop.permute.xlu1 %1173  ;;  %v2972_v29 = vpop.permute.xlu0 %1025 }
 0x1e0   : >> { %v1175_v40 = vrot.slane %v1174_v20, 7 }
 0x1e2   : >> { %v1176_v63 = vsel %vm768_vm0, %v1175_v40, %v1174_v20 }
 0x1e3   : >> { %v2974_v18 = vpop.permute.xlu1 %1070  ;;  %v2976_v30 = vpop.permute.xlu0 %1191  ;;  %v1178_v35 = vadd.f32 %v1176_v63, %v1113_v2  ;;  %v1064_v63 = vsel %vm637_vm1, %v2958_v57, %v1063_v26  ;;  %v3030_v2 = vsub.s32 2, %v2583_v53  ;;  %v1129_v57 = vsel %vm702_vm14, %v2968_v25, %v1128_v47 }
 0x1e7   : >> { %v2980_v54 = vpop.permute.xlu1 %1079  ;;  %v2982_v33 = vpop.permute.xlu0 %1245 }
 0x1e8   : >> { %v1247_v49 = vrot.slane %v2982_v33, 7 }
 0x1ea   : >> { %v1248_v27 = vsel %vm832_vm13, %v1247_v49, %v2982_v33 }
 0x1eb   : >> { %v1237_v41 = vpop.permute.xlu1 %1236  ;;  %v2986_v42 = vpop.permute.xlu0 %1034 }
 0x1ec   : >> { %v1238_v51 = vrot.slane %v1237_v41, 7 }
 0x1ee   : >> { %v1239_v1 = vsel %vm832_vm13, %v1238_v51, %v1237_v41  ;;  %v1001_v41 = vsel %vm573_vm15, %v2955_v48, %v1000_v62  ;;  %v470_v51 = vstv %s3478_s4  ;;  %v1193_v62 = vrot.slane %v2976_v30, 7 }
 0x1ef   : >> { %v2993_v4 = vpop.permute.xlu1 %1135  ;;  %v2995_v39 = vpop.permute.xlu0 %1144  ;;  %v1241_v40 = vadd.f32 %v1239_v1, %v1178_v35  ;;  %v1003_v21 = vadd.f32 %v1001_v41, %v964_v55  ;;  %v1122_v1 = vadd.f32 %v1120_v19, %v1057_v31  ;;  %v475_v35 = vld [vmem:[#allocation3 + $0x1] sm:$0xff]  ;;  %v471_v44 = vmul.f32 %v470_v51, %v468_v52 }
 0x1f0   : >> { %v484_v41 = vstv %s2561_s17  ;;  %v482_v19 = vld [vmem:[#allocation3 + $0x2] sm:$0xff]  ;;  %v1194_v25 = vsel %vm768_vm0, %v1193_v62, %v2976_v30  ;;  %v478_v33 = vmul.f32 %v477_v32, %v475_v35  ;;  %v472_v31 = vmul.f32 %v470_v51, %v469_v36 }
 0x1f1   : >> { %v1066_v53 = vadd.f32 %v1064_v63, %v1003_v21  ;;  %v1187_v26 = vadd.f32 %v1185_v59, %v1122_v1  ;;  %v965_v63 = vstv %s3479_s13  ;;  %v485_v1 = vmul.f32 %v484_v41, %v482_v19 }
 0x1f2   : >> { %v480_v35 = vadd.f32 %v478_v33, %v471_v44  ;;  %v1018_v19 = vrot.slane %v2970_v24, 1 }
 0x1f3   : >> { %v3008_v5 = vpop.permute.xlu1 %1088  ;;  %v1300_v20 = vpop.permute.xlu0 %1299  ;;  %v1131_v49 = vadd.f32 %v1129_v57, %v1066_v53 }
 0x1f4   : >> { %v1301_v37 = vrot.slane %v1300_v20, 7 }
 0x1f6   : >> { %v1302_v56 = vsel %vm896_vm11, %v1301_v37, %v1300_v20 }
 0x1f7   : >> { %v1304_v45 = vadd.f32 %v1302_v56, %v1241_v40  ;;  %v1255_v60 = vpop.permute.xlu1 %1254  ;;  %v3023_v48 = vpop.permute.xlu0 %1200  ;;  %v476_v40 = vld [vmem:[#allocation3 + $0x9] sm:$0xff]  ;;  %v1250_v56 = vadd.f32 %v1248_v27, %v1187_v26  ;;  %v487_v26 = vadd.f32 %v485_v1, %v480_v35 }
 0x1f8   : >> { %v1256_v20 = vrot.slane %v1255_v60, 7  ;;  %v479_v52 = vmul.f32 %v477_v32, %v476_v40  ;;  %v483_v27 = vld [vmem:[#allocation3 + $0xa] sm:$0xff]  ;;  %v968_v32 = vstv %s3480_s15 }
 0x1f9   : >> { %v1367_v58 = vrot.slane %v1304_v45, %v3015_v28  ;;  %v1363_v61 = vrot.slane %v1304_v45, %v3004_v50  ;;  %v1371_v55 = vrot.slane %v1304_v45, %v3030_v2  ;;  %v969_v33 = vmul.f32 %v968_v32, %v2693_v38 }
 0x1fa   : >> { %v1257_v59 = vsel %vm832_vm13, %v1256_v20, %v1255_v60  ;;  %v966_v60 = vmul.f32 %v965_v63, %v2693_v38  ;;  %v1009_v20 = vrot.slane %v2966_v23, 1  ;;  %v481_v53 = vadd.f32 %v479_v52, %v472_v31 }
 0x1fb   : >> { %v1309_v34 = vpop.permute.xlu1 %1308  ;;  %1374 = vrot.lane.b32.xlu1 %v1367_v58, %s2132_s6  ;;  %1372 = vrot.lane.b32.xlu0 %v1363_v61, %s2132_s6  ;;  %v3039_v37 = vpop.permute.xlu0 %1153  ;;  %v1196_v58 = vadd.f32 %v1194_v25, %v1131_v49  ;;  %v1072_v25 = vrot.slane %v2974_v18, 1  ;;  %v971_v31 = vstv %s3481_s7  ;;  %v1081_v63 = vrot.slane %v2980_v54, 1  ;;  %s1625_s7 = sshll.u32 (%p407_p3), %s2565_s3, 4  ;;  %s3184_s7 = int_to_ptr.vmem [resolvable:$true] %s1625_s7 }
 0x1fc   : >> { %v1310_v47 = vrot.slane %v1309_v34, 7  ;;  %v1846_v52 = vmul.f32 -1.442695, %v487_v26  ;;  %v967_v1 = vadd.f32 %v966_v60, %v2950_v43  ;;  %p2041_p12 = scmp.lt.s32.totalorder (%p407_p3), %s3184_s7, %s2039_s18 }
 0x1fd   : >> { %v1259_v57 = vadd.f32 %v1257_v59, %v1196_v58  ;;  %v1137_v59 = vrot.slane %v2993_v4, 1  ;;  %v974_v58 = vstv %s3482_s10  ;;  %s2034_s10 = scalar_lea.vmem (%p407_p3), %s3184_s7, 2048 }
 0x1fe   : >> { %v1311_v21 = vsel %vm896_vm11, %v1310_v47, %v1309_v34  ;;  %v486_v47 = vmul.f32 %v484_v41, %v483_v27  ;;  %v1082_v27 = vsel %vm637_vm1, %v2980_v54, %v1081_v63  ;;  %v1090_v54 = vrot.slane %v3008_v5, 1  ;;  %p2035_p0 = scmp.ne.s32.totalorder (%p407_p3), %s3184_s7, %s2034_s10  ;;  %p2042_p7 = scmp.lt.s32.totalorder (%p407_p3), %s2040_s21, %s2034_s10 }
 0x1ff   : >> { %v1313_v61 = vadd.f32 %v1311_v21, %v1250_v56  ;;  %v3048_v0 = vpop.permute.xlu1 %1097  ;;  %1376 = vrot.lane.b32.xlu0 %v1371_v55, %s2132_s6  ;;  %v1318_v30 = vpop.permute.xlu0 %1317  ;;  %v1010_v55 = vsel %vm573_vm15, %v2966_v23, %v1009_v20  ;;  %v1073_v23 = vsel %vm637_vm1, %v2974_v18, %v1072_v25  ;;  %v1975_v20 = vld [vmem:[#allocation2 + $0x1] ss:$2 sm:$0x7]  ;;  %1959 = vpow2.f32 %v1846_v52  ;;  %s3488_s6 = sld [smem:[#allocation119_spill]] (%p407_p3) }
 0x200   : >> { %v1319_v62 = vrot.slane %v1318_v30, 7  ;;  %v488_v21 = vadd.f32 %v486_v47, %v481_v53  ;;  %v1012_v35 = vadd.f32 %v1010_v55, %v967_v1  ;;  %v972_v32 = vmul.f32 %v1975_v20, %v971_v31  ;;  %p2036_p10 = pnand (%p407_p3), %p2035_p0, %p3489_p8  ;;  %p2043_p9 = por (%p407_p3), %p2042_p7, %p2041_p12 }
 0x201   : >> { %v1391_v45 = vrot.slane %v1313_v61, %v3004_v50  ;;  %v1395_v51 = vrot.slane %v1313_v61, %v3015_v28  ;;  %v1399_v49 = vrot.slane %v1313_v61, %v3030_v2  ;;  %v1019_v61 = vsel %vm573_vm15, %v2970_v24, %v1018_v19 }
 0x202   : >> { %v1320_v36 = vsel %vm896_vm11, %v1319_v62, %v1318_v30  ;;  %v1146_v30 = vrot.slane %v2995_v39, 1  ;;  %v1202_v62 = vrot.slane %v3023_v48, 7  ;;  %v1138_v24 = vsel %vm702_vm14, %v2993_v4, %v1137_v59  ;;  %p2037_p6 = pneg (%p407_p3), %p2036_p10 }
 0x203   : >> { %v1322_v34 = vadd.f32 %v1320_v36, %v1259_v57  ;;  %v1210_v40 = vpop.permute.xlu1 %1209  ;;  %1400 = vrot.lane.b32.xlu1 %v1391_v45, %s2133_s1  ;;  %1402 = vrot.lane.b32.xlu0 %v1395_v51, %s2133_s1  ;;  %v3056_v44 = vpop.permute.xlu0 %1162  ;;  %v970_v57 = vadd.f32 %v969_v33, %v2952_v3  ;;  %v1027_v51 = vrot.slane %v2972_v29, 1  ;;  %v1075_v36 = vadd.f32 %v1073_v23, %v1012_v35 }
 0x204   : >> { %v1211_v53 = vrot.slane %v1210_v40, 7  ;;  %v1147_v19 = vsel %vm702_vm14, %v2995_v39, %v1146_v30  ;;  %v1203_v4 = vsel %vm768_vm0, %v1202_v62, %v3023_v48  ;;  %v1155_v55 = vrot.slane %v3039_v37, 1  ;;  %p2044_p2 = pnand (%p407_p3), %p2043_p9, %p2037_p6 }
 0x205   : >> { %v1419_v56 = vrot.slane %v1322_v34, %v3004_v50  ;;  %v1423_v43 = vrot.slane %v1322_v34, %v3015_v28  ;;  %v1427_v45 = vrot.slane %v1322_v34, %v3030_v2  ;;  %v1021_v60 = vadd.f32 %v1019_v61, %v970_v57 }
 0x206   : >> { %v975_v34 = vmul.f32 %v1975_v20, %v974_v58  ;;  %v1140_v47 = vadd.f32 %v1138_v24, %v1075_v36  ;;  %v973_v63 = vadd.f32 %v972_v32, %v2961_v46  ;;  %v1212_v1 = vsel %vm768_vm0, %v1211_v53, %v1210_v40 }
 0x207   : >> { %v1264_v41 = vpop.permute.xlu1 %1263  ;;  %1404 = vrot.lane.b32.xlu1 %v1399_v49, %s2133_s1  ;;  %1428 = vrot.lane.b32.xlu0 %v1419_v56, %s2134_s14  ;;  %v1273_v38 = vpop.permute.xlu0 %1272  ;;  %v1084_v25 = vadd.f32 %v1082_v27, %v1021_v60  ;;  %v1847_v49 = vmul.f32 -1.442695, %v488_v21  ;;  %v1028_v56 = vsel %vm573_vm15, %v2972_v29, %v1027_v51  ;;  %v1091_v52 = vsel %vm637_vm1, %v3008_v5, %v1090_v54  ;;  %s1611_s1 = scalar_lea.sflag (%p407_p3), [#allocation6], %s2310_s19 }
 0x208   : >> { %v1265_v18 = vrot.slane %v1264_v41, 7  ;;  %v1274_v33 = vrot.slane %v1273_v38, 7  ;;  %v1205_v59 = vadd.f32 %v1203_v4, %v1140_v47  ;;  %v1030_v30 = vadd.f32 %v1028_v56, %v973_v63 }
 0x209   : >> { %v1149_v39 = vadd.f32 %v1147_v19, %v1084_v25  ;;  %v1036_v29 = vrot.slane %v2986_v42, 1  ;;  %1961 = vpow2.f32 %v1847_v49  ;;  %v1156_v46 = vsel %vm702_vm14, %v3039_v37, %v1155_v55  ;;  %v1960_v25 = vpop.eup %1959 }
 0x20a   : >> { %v1266_v31 = vsel %vm832_vm13, %v1265_v18, %v1264_v41  ;;  %v1275_v41 = vsel %vm832_vm13, %v1274_v33, %v1273_v38  ;;  %v1093_v57 = vadd.f32 %v1091_v52, %v1030_v30  ;;  %v976_v24 = vadd.f32 %v975_v34, %v2964_v22 }
 0x20b   : >> { %v1219_v26 = vpop.permute.xlu1 %1218  ;;  %1430 = vrot.lane.b32.xlu1 %v1423_v43, %s2134_s14  ;;  %1432 = vrot.lane.b32.xlu0 %v1427_v45, %s2134_s14  ;;  %v3084_v3 = vpop.permute.xlu0 %1227  ;;  %v1268_v62 = vadd.f32 %v1266_v31, %v1205_v59  ;;  %v1214_v35 = vadd.f32 %v1212_v1, %v1149_v39  ;;  %v1099_v43 = vrot.slane %v3048_v0, 1  ;;  %v1037_v37 = vsel %vm573_vm15, %v2986_v42, %v1036_v29 }
 0x20c   : >> { %v1220_v61 = vrot.slane %v1219_v26, 7  ;;  %v1158_v20 = vadd.f32 %v1156_v46, %v1093_v57  ;;  %v1164_v32 = vrot.slane %v3056_v44, 1  ;;  %v1229_v34 = vrot.slane %v3084_v3, 7 }
 0x20d   : >> { %v1277_v18 = vadd.f32 %v1275_v41, %v1214_v35  ;;  %v1100_v22 = vsel %vm637_vm1, %v3048_v0, %v1099_v43  ;;  %v1039_v42 = vadd.f32 %v1037_v37, %v976_v24  ;;  %vm1434_vm15 = vcmask 400384  }
 0x20e   : >> { %v1221_v38 = vsel %vm768_vm0, %v1220_v61, %v1219_v26  ;;  %v1165_v33 = vsel %vm702_vm14, %v3056_v44, %v1164_v32  ;;  %v1230_v39 = vsel %vm768_vm0, %v1229_v34, %v3084_v3  ;;  %v495_v3 = vadd.f32 1.0, %v1960_v25 }
 0x20f   : >> { %v1327_v58 = vpop.permute.xlu1 %1326  ;;  %v1336_v48 = vpop.permute.xlu0 %1335  ;;  %v1223_v26 = vadd.f32 %v1221_v38, %v1158_v20  ;;  %v1102_v31 = vadd.f32 %v1100_v22, %v1039_v42  ;;  %vm1406_vm0 = vcmask 408576   ;;  %vm1489_vm1 = vcmask 384000  }
 0x210   : >> { %v1328_v21 = vrot.slane %v1327_v58, 7  ;;  %v1337_v23 = vrot.slane %v1336_v48, 7  ;;  %1963 = vrcp.f32 %v495_v3  ;;  %vm1517_vm14 = vcmask 375808  }
 0x212   : >> { %v1329_v40 = vsel %vm896_vm11, %v1328_v21, %v1327_v58  ;;  %v1338_v45 = vsel %vm896_vm11, %v1337_v23, %v1336_v48  ;;  %v1167_v58 = vadd.f32 %v1165_v33, %v1102_v31 }
 0x213   : >> { %v1331_v5 = vadd.f32 %v1329_v40, %v1268_v62  ;;  %v1282_v51 = vpop.permute.xlu1 %1281  ;;  %v1345_v27 = vpop.permute.xlu0 %1344  ;;  %v1340_v53 = vadd.f32 %v1338_v45, %v1277_v18 }
 0x214   : >> { %v1283_v60 = vrot.slane %v1282_v51, 7  ;;  %v1346_v54 = vrot.slane %v1345_v27, 7  ;;  %v1962_v1 = vpop.eup %1961  ;;  %v1232_v21 = vadd.f32 %v1230_v39, %v1167_v58 }
 0x215   : >> { %v1447_v36 = vrot.slane %v1331_v5, %v3004_v50  ;;  %v1451_v4 = vrot.slane %v1331_v5, %v3015_v28  ;;  %v1455_v49 = vrot.slane %v1331_v5, %v3030_v2  ;;  %v1474_v63 = vrot.slane %v1340_v53, %v3004_v50 }
 0x216   : >> { %v1284_v19 = vsel %vm832_vm13, %v1283_v60, %v1282_v51  ;;  %v1347_v0 = vsel %vm896_vm11, %v1346_v54, %v1345_v27  ;;  %v1478_v44 = vrot.slane %v1340_v53, %v3015_v28  ;;  %v1482_v23 = vrot.slane %v1340_v53, %v3030_v2 }
 0x217   : >> { %v1291_v47 = vpop.permute.xlu1 %1290  ;;  %1456 = vrot.lane.b32.xlu1 %v1447_v36, %s3422_s5  ;;  %1458 = vrot.lane.b32.xlu0 %v1451_v4, %s3422_s5  ;;  %v1286_v56 = vadd.f32 %v1284_v19, %v1223_v26  ;;  %v496_v62 = vadd.f32 1.0, %v1962_v1 }
 0x218   : >> { %v1292_v55 = vrot.slane %v1291_v47, 7 }
 0x219   : >> { %v1349_v52 = vadd.f32 %v1347_v0, %v1286_v56  ;;  %1965 = vrcp.f32 %v496_v62 }
 0x21a   : >> { %v1293_v61 = vsel %vm832_vm13, %v1292_v55, %v1291_v47  ;;  %v1964_v45 = vpop.eup %1963 }
 0x21b   : >> { %v1354_v59 = vpop.permute.xlu1 %1353  ;;  %1460 = vrot.lane.b32.xlu1 %v1455_v49, %s3422_s5  ;;  %1483 = vrot.lane.b32.xlu0 %v1474_v63, %s2135_s12  ;;  %v1295_v29 = vadd.f32 %v1293_v61, %v1232_v21  ;;  %v1502_v41 = vrot.slane %v1349_v52, %v3004_v50  ;;  %v1506_v46 = vrot.slane %v1349_v52, %v3015_v28  ;;  %s2136_s5 = smov 46  }
 0x21c   : >> { %v1355_v48 = vrot.slane %v1354_v59, 7  ;;  %v1510_v40 = vrot.slane %v1349_v52, %v3030_v2 }
 0x21e   : >> { %v1356_v30 = vsel %vm896_vm11, %v1355_v48, %v1354_v59  ;;  %vm1378_vm11 = vcmask 416768  }
 0x21f   : >> { %1485 = vrot.lane.b32.xlu1 %v1478_v44, %s2135_s12  ;;  %1487 = vrot.lane.b32.xlu0 %v1482_v23, %s2135_s12  ;;  %v1358_v35 = vadd.f32 %v1356_v30, %v1295_v29 }
 0x221   : >> { %v1530_v57 = vrot.slane %v1358_v35, %v3004_v50  ;;  %v1534_v43 = vrot.slane %v1358_v35, %v3015_v28  ;;  %v1538_v5 = vrot.slane %v1358_v35, %v3030_v2 }
 0x223   : >> { %1511 = vrot.lane.b32.xlu1 %v1502_v41, %s2136_s5  ;;  %1513 = vrot.lane.b32.xlu0 %v1506_v46, %s2136_s5  ;;  %v1966_v51 = vpop.eup %1965 }
 0x227   : >> { %1515 = vrot.lane.b32.xlu1 %v1510_v40, %s2136_s5  ;;  %1539 = vrot.lane.b32.xlu0 %v1530_v57, %s2137_s9 }
 0x22b   : >> { %1541 = vrot.lane.b32.xlu1 %v1534_v43, %s2137_s9  ;;  %1543 = vrot.lane.b32.xlu0 %v1538_v5, %s2137_s9 }
 0x22f   : >> { %1572 = vperm.xlu1 %1957, %v1964_v45   ;;  %1577 = vperm.xlu0 %1958, %v1966_v51  }
 0x26d   : >> { %v1373_v27 = vpop.permute.xlu0 %1372  ;;  %v1375_v18 = vpop.permute.xlu1 %1374 }
 0x26e   : >> { %v1379_v22 = vsel %vm1378_vm11, %v1373_v27, %v1375_v18 }
 0x26f   : >> { %v1383_v56 = vsel %vm246_vm2, %v1379_v22, 0.0  ;;  %v1568_v22 = vld [vmem:[%s2576_s20 + $0x10] sm:$0xff] }
 0x271   : >> { %v1377_v24 = vpop.permute.xlu0 %1376 }
 0x272   : >> { %v1380_v47 = vsel %vm1378_vm11, %v1375_v18, %v1377_v24  ;;  %vm3484_vm11 = vcmp.lt.s32.totalorder %v2388_v17, 16 }
 0x273   : >> { %v1384_v63 = vsel %vm247_vm6, %v1380_v47, 0.0  ;;  %v1569_v47 = vld [vmem:[%s2576_s20 + $0x18] sm:$0xff] }
 0x275   : >> { %v1401_v38 = vpop.permute.xlu1 %1400  ;;  %v1403_v60 = vpop.permute.xlu0 %1402 }
 0x276   : >> { %v1407_v54 = vsel %vm1406_vm0, %v1401_v38, %v1403_v60 }
 0x277   : >> { %v1411_v42 = vsel %vm254_vm3, %v1407_v54, 0.0 }
 0x278   : >> { %v1413_v0 = vadd.f32 %v1411_v42, %v1383_v56 }
 0x279   : >> { %v1405_v37 = vpop.permute.xlu1 %1404  ;;  %v1429_v20 = vpop.permute.xlu0 %1428 }
 0x27a   : >> { %v1408_v4 = vsel %vm1406_vm0, %v1403_v60, %v1405_v37  ;;  %vm1545_vm0 = vcmask 367616  }
 0x27b   : >> { %v1412_v49 = vsel %vm255_vm7, %v1408_v4, 0.0  ;;  %v1566_v4 = vld [vmem:[%s2576_s20] sm:$0xff] }
 0x27c   : >> { %v1414_v58 = vadd.f32 %v1412_v49, %v1384_v63 }
 0x27d   : >> { %v1431_v32 = vpop.permute.xlu1 %1430  ;;  %v1433_v36 = vpop.permute.xlu0 %1432 }
 0x27e   : >> { %v1435_v26 = vsel %vm1434_vm15, %v1429_v20, %v1431_v32  ;;  %v1436_v33 = vsel %vm1434_vm15, %v1431_v32, %v1433_v36 }
 0x27f   : >> { %v1439_v55 = vsel %vm262_vm4, %v1435_v26, 0.0  ;;  %v1440_v39 = vsel %vm263_vm9, %v1436_v33, 0.0 }
 0x280   : >> { %v1441_v52 = vadd.f32 %v1439_v55, %v1413_v0  ;;  %v1442_v23 = vadd.f32 %v1440_v39, %v1414_v58 }
 0x289   : >> { %v1457_v53 = vpop.permute.xlu1 %1456  ;;  %v1459_v19 = vpop.permute.xlu0 %1458 }
 0x28a   : >> { %v1462_v48 = vsel %vm832_vm13, %v1457_v53, %v1459_v19 }
 0x28b   : >> { %v1468_v29 = vadd.f32 %v1462_v48, %v1441_v52 }
 0x28d   : >> { %v1461_v28 = vpop.permute.xlu1 %1460  ;;  %v1484_v2 = vpop.permute.xlu0 %1483 }
 0x28e   : >> { %v1463_v61 = vsel %vm832_vm13, %v1459_v19, %v1461_v28  ;;  %vm3483_vm13 = vcmp.lt.s32.totalorder %v2359_v11, 16 }
 0x28f   : >> { %v1469_v35 = vadd.f32 %v1463_v61, %v1442_v23 }
 0x291   : >> { %v1486_v25 = vpop.permute.xlu1 %1485  ;;  %v1488_v34 = vpop.permute.xlu0 %1487 }
 0x292   : >> { %v1490_v59 = vsel %vm1489_vm1, %v1484_v2, %v1486_v25  ;;  %v1491_v44 = vsel %vm1489_vm1, %v1486_v25, %v1488_v34  ;;  %v1567_v34 = vld [vmem:[%s2576_s20 + $0x8] sm:$0xff]  ;;  %s3486_s20 = sld [smem:[#allocation20_spill]] (%p407_p3) }
 0x293   : >> { %v1494_v30 = vsel %vm278_vm5, %v1490_v59, 0.0  ;;  %v1495_v62 = vsel %vm279_vm10, %v1491_v44, 0.0 }
 0x294   : >> { %v1496_v57 = vadd.f32 %v1494_v30, %v1468_v29  ;;  %v1497_v5 = vadd.f32 %v1495_v62, %v1469_v35 }
 0x295   : >> { %v1512_v31 = vpop.permute.xlu1 %1511  ;;  %v1514_v1 = vpop.permute.xlu0 %1513 }
 0x296   : >> { %v1518_v21 = vsel %vm1517_vm14, %v1512_v31, %v1514_v1 }
 0x297   : >> { %v1522_v40 = vsel %vm286_vm8, %v1518_v21, 0.0 }
 0x298   : >> { %v1524_v51 = vadd.f32 %v1522_v40, %v1496_v57  ;;  %s1862_s11 = sshll.u32 (%p407_p3), %s3486_s20, 11 }
 0x299   : >> { %v1516_v3 = vpop.permute.xlu1 %1515  ;;  %v1540_v46 = vpop.permute.xlu0 %1539  ;;  %s3181_s15 = scalar_lea.hbm (%p407_p3), %s3488_s6, %s1862_s11 }
 0x29a   : >> { %v1519_v41 = vsel %vm1517_vm14, %v1514_v1, %v1516_v3 }
 0x29b   : >> { %v1523_v43 = vsel %vm287_vm12, %v1519_v41, 0.0 }
 0x29c   : >> { %v1525_v18 = vadd.f32 %v1523_v43, %v1497_v5 }
 0x29d   : >> { %v1542_v45 = vpop.permute.xlu1 %1541  ;;  %v1544_v24 = vpop.permute.xlu0 %1543 }
 0x29e   : >> { %v1546_v27 = vsel %vm1545_vm0, %v1540_v46, %v1542_v45  ;;  %v1547_v60 = vsel %vm1545_vm0, %v1542_v45, %v1544_v24 }
 0x29f   : >> { %v1550_v38 = vsel %vm3483_vm13, %v1546_v27, 0.0  ;;  %v1551_v20 = vsel %vm3484_vm11, %v1547_v60, 0.0 }
 0x2a0   : >> { %v1552_v37 = vadd.f32 %v1550_v38, %v1524_v51  ;;  %v1553_v32 = vadd.f32 %v1551_v20, %v1525_v18 }
 0x2a2   : >> { %v1848_v36 = vmul.f32 -1.442695, %v1552_v37  ;;  %v1849_v53 = vmul.f32 -1.442695, %v1553_v32 }
 0x2a4   : >> { %1967 = vpow2.f32 %v1848_v36 }
 0x2a5   : >> { %1969 = vpow2.f32 %v1849_v53 }
 0x2ae   : >> { %v1968_v19 = vpop.eup %1967  ;;  %v1573_v25 = vpop.permute.xlu1 %1572 }
 0x2af   : >> { %v1970_v28 = vpop.eup %1969  ;;  %v1560_v2 = vadd.f32 1.0, %v1968_v19  ;;  %v1578_v26 = vpop.permute.xlu0 %1577  ;;  %v1580_v42 = vmul.f32 %v1573_v25, %v1566_v4  ;;  %v1581_v56 = vmul.f32 %v1573_v25, %v1567_v34 }
 0x2b0   : >> { %v1561_v54 = vadd.f32 1.0, %v1970_v28  ;;  %v1582_v33 = vmul.f32 %v1578_v26, %v1568_v22  ;;  %v1583_v55 = vmul.f32 %v1578_v26, %v1569_v47 }
 0x2b1   : >> { %1971 = vrcp.f32 %v1560_v2  ;;  %v1584_v39 = vmul.f32 %v1580_v42, %v1566_v4  ;;  %v1585_v48 = vmul.f32 %v1581_v56, %v1567_v34 }
 0x2b2   : >> { %1973 = vrcp.f32 %v1561_v54  ;;  %v1586_v58 = vmul.f32 %v1582_v33, %v1568_v22  ;;  %v1587_v61 = vmul.f32 %v1583_v55, %v1569_v47 }
 0x2bb   : >> { %v1972_v49 = vpop.eup %1971 }
 0x2bc   : >> { %v1974_v31 = vpop.eup %1973  ;;  %v1591_v63 = vrot.slane %v1972_v49, %v3004_v50 }
 0x2bd   : >> { %v1595_v0 = vrot.slane %v1974_v31, %v3004_v50  ;;  %409 = sbr.rel (!%p407_p3) target bundleno = 212 (0xd4), region = 102 }
 0x2be   : >> { %v1596_v59 = vmul.f32 %v1591_v63, %v1566_v4  ;;  %v1598_v1 = vmul.f32 %v1591_v63, %v1568_v22 }
 0x2bf   : >> { %v1597_v44 = vmul.f32 %v1595_v0, %v1567_v34  ;;  %v1599_v52 = vmul.f32 %v1595_v0, %v1569_v47 }
 0x2c0   : >> { %v1600_v21 = vadd.f32 %v1596_v59, %v1584_v39  ;;  %v1602_v23 = vadd.f32 %v1598_v1, %v1586_v58 }
 0x2c1   : >> { %v1601_v30 = vadd.f32 %v1597_v44, %v1585_v48  ;;  %v1603_v3 = vadd.f32 %v1599_v52, %v1587_v61 }
 0x2c2   : >> { %1606 = vst [vmem:[%s1605_s2] sm:$0xff] %v1600_v21  ;;  %1608 = vst [vmem:[%s1605_s2 + $0x10] sm:$0xff] %v1602_v23 }
 0x2c3   : >> { %1607 = vst [vmem:[%s1605_s2 + $0x8] sm:$0xff] %v1601_v30  ;;  %1609 = vst [vmem:[%s1605_s2 + $0x18] sm:$0xff] %v1603_v3 }
 0x2c4   : > { %2047 = shalt.err (!%p2044_p2)
}
 0x2c5   : > { %s2048_s3 = scalar_lea.hbm %s3181_s15, 2048  ;;  %s2052_s26 = scalar_lea.hbm %s3488_s6, 4096 }
 0x2c6   : > { %p2049_p11 = scmp.ne.s32.totalorder %s3181_s15, %s2048_s3  ;;  %p2053_p5 = scmp.lt.u32.totalorder %s3181_s15, %s3488_s6 }
 0x2c7   : > { %p2054_p13 = scmp.lt.u32.totalorder %s2052_s26, %s2048_s3  ;;  %p2056_p0 = scmp.lt.u32.totalorder %s2048_s3, %s3181_s15 }
 0x2c8   : > { %p2050_p1 = pnand %p2049_p11, %p3489_p8 }
 0x2c9   : > { %p2055_p3 = por %p2054_p13, %p2053_p5 }
 0x2ca   : > { %p2051_p4 = pneg %p2050_p1 }
 0x2cb   : > { %p2057_p10 = por %p2056_p0, %p2055_p3 }
 0x2cd   : > { %p2058_p6 = pnand %p2057_p10, %p2051_p4 }
 0x2cf   : > { %2061 = shalt.err (!%p2058_p6)
}
 0x2d0   : > { %s2139_s23 = smov 256   ;;  %s2140_s22 = smov 16  }
 0x2d1   : > { %1873 = dma.vmem_to_hbm [thread:$0]  (%p3489_p8), %s3184_s7, 2048, %s3181_s15, %s1611_s1, %s2139_s23, %s2139_s23, %s2140_s22  }
 0x2d2 PF: > { %s3490_s27 = sld [smem:[#allocation16_spill]]  ;;  %s3491_s28 = sld [smem:[#allocation24_spill]] }
 0x2d3   : > { %s3492_s30 = sld [smem:[#allocation19_spill]] }
 0x2d8   : > { %s1640_s14 = sand.u32 1, %s3490_s27   ;;  %p3493_p12 = scmp.ne.s32.totalorder %s3491_s28, 0 }
 0x2d9   : > { %p3494_p7 = scmp.ge.s32.totalorder %s3492_s30, 2  ;;  %s1641_s12 = scalar_lea.sflag [#allocation6], %s1640_s14 }
 0x2db   : > { %p1887_p9 = pnand %p3494_p7, %p3493_p12 }
 0x2dd   : > { %2095 = dma.done.wait (!%p1887_p9), %s1641_s12, 2048  }
 0x2de   : > { %2097 = vsyncadd (!%p1887_p9), %s1641_s12, 4294965248  ;;  %s3495_s15 = sld [smem:[#allocation21_spill]]  ;;  %s3496_s12 = sld [smem:[#allocation17_spill]] }
 0x2df   : > { %s3497_s13 = sld [smem:[#allocation18_spill]]  ;;  %s3498_s14 = sld [smem:[#allocation22_spill]] }
 0x2e4   : > { %p18_p2 = scmp.ge.s32.totalorder %s3495_s15, 4  }
 0x2e6   :  { %20 = sbr.rel (!%p18_p2) target bundleno = 12 (0xc), region = 113 }
 0x2ed   :  { %1646 = vsyncpa [#allocation5], 1 }
 0x2ee   :  { %1648 = vsyncpa [#allocation5 + $0x1], 1 }
 0x2ef   :  { %1649 = vsyncpa [#allocation6], 1 }
 0x2f0   :  { %1651 = vsyncpa [#allocation6 + $0x1], 1 }
 0x2f1   :  { %1652 = vsyncpa [#allocation7], 1 }
 0x2f2   :  { %1654 = vsyncpa [#allocation7 + $0x1], 1 }
 0x2f3   :  { %1655 = vsyncpa [#allocation8], 1 }
 0x2f4   :  { %1657 = vsyncpa [#allocation8 + $0x1], 1 }

</bundles_post_ra>
